<compile_context>
chip_gen: v7x
topology: tpu7x:2x2x1
jax: 0.10.0
libtpu: 0.0.40
codegen_flags: <defaults>
</compile_context>

<pallas_src>
import functools

import jax
import jax.numpy as jnp
from jax.experimental import pallas as pl
from jax.experimental.pallas import tpu as pltpu


def _round_up(x, m):
    return ((x + m - 1) // m) * m


def _vmem_capacity_bytes():
    try:
        return int(pltpu.get_tpu_info().vmem_capacity_bytes)
    except Exception:
        return 64 << 20          # conservative fallback (v7x physical VMEM)


# -----------------------------------------------------------------------------
# Kernel A: anomaly scores = sigmoid(|(x - mean) * inv_std|)  (pure VPU, mem-bound)
# -----------------------------------------------------------------------------
def anomaly_kernel(x_ref, mean_ref, inv_std_ref, anom_ref):
    anom_ref[...] = jax.nn.sigmoid(
        jnp.abs((x_ref[...] - mean_ref[...]) * inv_std_ref[...]))


def _anomaly_scores(x, mean, inv_std):
    B, T, D = x.shape
    n = B * T * D
    if D % 128 == 0:
        width, x2, m2, s2 = D, x.reshape(B * T, D), mean, inv_std
    elif (128 % D == 0) and (n % 128 == 0):
        # Lane-dense view: flatten to 128-wide rows, tile the stats to width 128.
        rep = 128 // D
        width = 128
        x2 = x.reshape(n // 128, 128)
        m2 = jnp.tile(mean, (1, rep))
        s2 = jnp.tile(inv_std, (1, rep))
    else:
        width, x2, m2, s2 = D, x.reshape(B * T, D), mean, inv_std

    rows = x2.shape[0]
    # ~2 MiB f32 per block, multiple of 8 rows (or the full row count).
    rb = max(8, ((2 << 20) // (4 * width)) // 8 * 8)
    rb = rows if rb >= rows else rb
    grid = (pl.cdiv(rows, rb),)

    out = pl.pallas_call(
        anomaly_kernel,
        out_shape=jax.ShapeDtypeStruct((rows, width), jnp.float32),
        grid=grid,
        in_specs=[pl.BlockSpec((rb, width), lambda i: (i, 0)),
                  pl.BlockSpec((1, width), lambda i: (0, 0)),
                  pl.BlockSpec((1, width), lambda i: (0, 0))],
        out_specs=pl.BlockSpec((rb, width), lambda i: (i, 0)),
        compiler_params=pltpu.CompilerParams(
            dimension_semantics=("parallel",)),
    )(x2, m2, s2)
    return out.reshape(B, T, D)


# -----------------------------------------------------------------------------
# Kernel B: per batch-chunk — bulk fc1+ReLU and input->gate projection (MXU),
# serial GRU recurrence over T (one [Bb,Hp]@[Hp,3Hp] dot per step), bulk
# fc2+sigmoid. Everything time-major inside the block so each timestep is a
# contiguous, fully (8,128)-tiled row slab of the VMEM scratches.
# -----------------------------------------------------------------------------
def gdn_recurrent_kernel(
    x_ref,                 # [T, Bb, D]  f32 (time-major block of the padded input)
    w1_ref, b1_ref,        # [D, Hp] bf16, [1, Hp] f32
    wi_ref, bi_ref,        # [Hp, 3Hp] bf16, [1, 3Hp] f32  (bh_r/bh_z folded into bi)
    wh_ref, bhn_ref,       # [Hp, 3Hp] bf16, [1, Hp] f32   (only the n-gate hidden bias)
    w2_ref, b2_ref,        # [Hp, Op] bf16, [1, Op] f32
    pred_ref,              # [T, Bb, Op] f32
    gates_scr,             # VMEM [T*Bb, 3Hp] f32 : precomputed input-path gates
    hs_scr,                # VMEM [T*Bb, Hp]  f32 : per-step hidden states
    *, bb, seq_len, hidden,
):
    hp = hidden
    rows = seq_len * bb
    d = x_ref.shape[-1]
    op = pred_ref.shape[-1]

    # ---- bulk, non-recurrent MXU work hoisted out of the time loop ----------
    x2 = x_ref[...].reshape(rows, d).astype(jnp.bfloat16)
    a = jnp.maximum(
        jnp.dot(x2, w1_ref[...], preferred_element_type=jnp.float32)
        + b1_ref[...], 0.0)                                          # [rows, Hp]
    gates_scr[...] = (
        jnp.dot(a.astype(jnp.bfloat16), wi_ref[...],
                preferred_element_type=jnp.float32) + bi_ref[...])   # [rows, 3Hp]

    # TODO(synk): weight-stationary hidden path (pltpu.matmul_push_rhs once,
    # matmul_acc_lhs/pop per step) to avoid re-streaming wh every iteration.
    wh_b = wh_ref[...]                                   # loop-invariant bf16 weights
    bhn_b = jnp.broadcast_to(bhn_ref[...], (bb, hp))     # hoisted broadcast

    # ---- sequential GRU: one [Bb, Hp] @ [Hp, 3Hp] dot per timestep ----------
    def step(t, h):
        row0 = pl.multiple_of(t * bb, bb)                # bb is a multiple of 8
        g = gates_scr[pl.ds(row0, bb), :]                # full-tile contiguous read
        hg = jnp.dot(h.astype(jnp.bfloat16), wh_b,
                     preferred_element_type=jnp.float32)
        r = jax.nn.sigmoid(g[:, 0:hp] + hg[:, 0:hp])
        z = jax.nn.sigmoid(g[:, hp:2 * hp] + hg[:, hp:2 * hp])
        n = jnp.tanh(g[:, 2 * hp:3 * hp] + r * (hg[:, 2 * hp:3 * hp] + bhn_b))
        h_new = (1.0 - z) * n + z * h
        hs_scr[pl.ds(row0, bb), :] = h_new               # full-tile contiguous store
        return h_new

    h0 = jnp.zeros((bb, hp), jnp.float32)
    unroll = True if seq_len <= 16 else 4                # modest unroll: avoid spills
    jax.lax.fori_loop(0, seq_len, step, h0, unroll=unroll)

    # ---- bulk fc2 + sigmoid: one matmul, one lane-dense store ----------------
    p = jax.nn.sigmoid(
        jnp.dot(hs_scr[...].astype(jnp.bfloat16), w2_ref[...],
                preferred_element_type=jnp.float32) + b2_ref[...])   # [rows, Op]
    pred_ref[...] = p.reshape(seq_len, bb, op)


def _recurrent_vmem_bytes(bb, t, d, hp, op):
    rows = bb * t
    x_blk = 2 * rows * d * 4                      # double-buffered input block
    out_blk = 2 * rows * op * 4                   # double-buffered output block
    scr = rows * (3 * hp + hp) * 4                # gates_scr + hs_scr
    tmp = rows * (hp + 3 * hp) * 4                # fc1 temp 'a' + gates value pre-store
    wts = 2 * (d * hp + 6 * hp * hp + hp * op)    # bf16 weights
    bias = 4 * (hp + 3 * hp + hp + op)
    return x_blk + out_blk + scr + tmp + wts + bias


def _choose_bb(batch, t, d, hp, op, budget):
    bb = _round_up(max(batch, 1), 8)
    while bb > 8 and _recurrent_vmem_bytes(bb, t, d, hp, op) > budget:
        bb = max(8, ((bb // 2) + 7) // 8 * 8)
    return bb


@jax.jit
def gdn_forward(x, params):
    """x: [B, T, D] float32 -> (predictions [B, T, O], anomaly_scores [B, T, D])."""
    B, T, D = x.shape
    H = params["w1"].shape[1]
    O = params["w2"].shape[1]
    f32 = jnp.float32
    bf16 = jnp.bfloat16

    # ---- anomaly pass (reciprocal hoisted; lane-dense elementwise kernel) ----
    inv_std = 1.0 / (params["std"] + 1e-6)
    anom = _anomaly_scores(x, params["mean"], inv_std)

    # ---- padding / chunking for the recurrent pass ---------------------------
    Hp = _round_up(H, 128)
    Op = _round_up(O, 128)
    cap = _vmem_capacity_bytes()
    budget = max(8 << 20, int(cap * 0.30))
    Bb = _choose_bb(B, T, D, Hp, Op, budget)
    Bp = _round_up(B, Bb)

    def pad2(a, r, c):
        return jnp.pad(a, ((0, r - a.shape[0]), (0, c - a.shape[1])))

    def pad_gates(a, rows_to):
        # a: [rin, 3H] -> [rows_to, 3Hp], each gate block (r|z|n) padded independently
        parts = [pad2(a[:, i * H:(i + 1) * H], rows_to, Hp) for i in range(3)]
        return jnp.concatenate(parts, axis=1)

    # Fold the r/z hidden biases into the input-path bias; keep only bh_n.
    bi_f = params["bi"] + jnp.concatenate(
        [params["bh"][:, :H], params["bh"][:, H:2 * H], jnp.zeros((1, H), f32)],
        axis=1)

    w1p = pad2(params["w1"], D, Hp).astype(bf16)
    b1p = pad2(params["b1"], 1, Hp)
    wip = pad_gates(params["wi"], Hp).astype(bf16)
    bip = pad_gates(bi_f, 1)
    whp = pad_gates(params["wh"], Hp).astype(bf16)
    bhn = pad2(params["bh"][:, 2 * H:3 * H], 1, Hp)
    w2p = pad2(params["w2"], Hp, Op).astype(bf16)
    b2p = pad2(params["b2"], 1, Op)

    # Time-major, batch-padded input so each timestep is a contiguous row block.
    # TODO(synk): fold this transpose into an in-kernel VMEM relayout (or a
    # strided per-step gate read) to save one HBM round trip of x.
    x_tm = jnp.transpose(jnp.pad(x, ((0, Bp - B), (0, 0), (0, 0))), (1, 0, 2))

    vmem_est = _recurrent_vmem_bytes(Bb, T, D, Hp, Op)
    vmem_limit = int(min(max(3 * vmem_est, 16 << 20), int(cap * 0.70)))

    cost = pl.CostEstimate(
        flops=int(2 * Bp * T * (D * Hp + 6 * Hp * Hp + Hp * Op)),
        transcendentals=int(Bp * T * (3 * Hp + Op)),
        bytes_accessed=int(4 * Bp * T * (D + Op)
                           + 2 * (D * Hp + 6 * Hp * Hp + Hp * Op)))

    full = lambda a: pl.BlockSpec(a.shape, lambda i: (0, 0))

    pred_tm = pl.pallas_call(
        functools.partial(gdn_recurrent_kernel, bb=Bb, seq_len=T, hidden=Hp),
        out_shape=jax.ShapeDtypeStruct((T, Bp, Op), f32),
        grid=(Bp // Bb,),
        in_specs=[pl.BlockSpec((T, Bb, D), lambda i: (0, i, 0)),
                  full(w1p), full(b1p), full(wip), full(bip),
                  full(whp), full(bhn), full(w2p), full(b2p)],
        out_specs=pl.BlockSpec((T, Bb, Op), lambda i: (0, i, 0)),
        scratch_shapes=[pltpu.VMEM((T * Bb, 3 * Hp), f32),
                        pltpu.VMEM((T * Bb, Hp), f32)],
        compiler_params=pltpu.CompilerParams(
            dimension_semantics=("parallel",),
            vmem_limit_bytes=vmem_limit),
        cost_estimate=cost,
    )(x_tm, w1p, b1p, wip, bip, whp, bhn, w2p, b2p)

    # Slice padded batch/output columns off, back to [B, T, O].
    pred = jnp.transpose(pred_tm[:, :B, :O], (1, 0, 2))
    return pred, anom


# -----------------------------------------------------------------------------
# Parameter init (torch-compatible shapes, math-oriented x @ W layout) + reference
# -----------------------------------------------------------------------------
def init_params(key, input_dim, hidden_dim, output_dim):
    H = hidden_dim
    ks = jax.random.split(key, 16)
    u = lambda k, shape, bound: jax.random.uniform(
        k, shape, jnp.float32, minval=-bound, maxval=bound)
    b1 = 1.0 / jnp.sqrt(input_dim)
    bh = 1.0 / jnp.sqrt(hidden_dim)
    wi = jnp.concatenate(
        [u(ks[2], (H, H), bh), u(ks[3], (H, H), bh), u(ks[4], (H, H), bh)], axis=1)
    wh = jnp.concatenate(
        [u(ks[5], (H, H), bh), u(ks[6], (H, H), bh), u(ks[7], (H, H), bh)], axis=1)
    bi = jnp.concatenate(
        [u(ks[8], (1, H), bh), u(ks[9], (1, H), bh), u(ks[10], (1, H), bh)], axis=1)
    bhb = jnp.concatenate(
        [u(ks[11], (1, H), bh), u(ks[12], (1, H), bh), u(ks[13], (1, H), bh)], axis=1)
    return {
        "mean": jnp.zeros((1, input_dim), jnp.float32),
        "std": jnp.ones((1, input_dim), jnp.float32),
        "w1": u(ks[0], (input_dim, H), b1),
        "b1": u(ks[1], (1, H), b1),
        "wi": wi, "bi": bi, "wh": wh, "bh": bhb,
        "w2": u(ks[14], (H, output_dim), bh),
        "b2": u(ks[15], (1, output_dim), bh),
    }


def gdn_reference(x, p):
    """Pure-JAX f32 reference of the torch forward, for verification."""
    anomaly = jax.nn.sigmoid(jnp.abs((x - p["mean"][0]) / (p["std"][0] + 1e-6)))
    H = p["w1"].shape[1]
    a = jnp.maximum(jnp.einsum("btd,dh->bth", x, p["w1"]) + p["b1"][0], 0.0)
    g_in = jnp.einsum("bth,hk->btk", a, p["wi"]) + p["bi"][0]

    def cell(h, g_t):
        hg = h @ p["wh"] + p["bh"][0]
        r = jax.nn.sigmoid(g_t[:, :H] + hg[:, :H])
        z = jax.nn.sigmoid(g_t[:, H:2 * H] + hg[:, H:2 * H])
        n = jnp.tanh(g_t[:, 2 * H:] + r * hg[:, 2 * H:])
        h_new = (1.0 - z) * n + z * h
        return h_new, h_new

    B, T, D = x.shape
    h0 = jnp.zeros((B, H), jnp.float32)
    _, hs = jax.lax.scan(cell, h0, jnp.transpose(g_in, (1, 0, 2)))
    gru_out = jnp.transpose(hs, (1, 0, 2))
    preds = jax.nn.sigmoid(jnp.einsum("bth,ho->bto", gru_out, p["w2"]) + p["b2"][0])
    return preds, anomaly


if __name__ == "__main__":
    B, T, D_IN, H, D_OUT = 2, 8, 32, 32, 4

    key = jax.random.PRNGKey(0)
    k_x, k_p = jax.random.split(key)
    x = jax.random.normal(k_x, (B, T, D_IN), jnp.float32)
    params = init_params(k_p, D_IN, H, D_OUT)

    preds, anomaly = gdn_forward(x, params)
    preds, anomaly = jax.block_until_ready((preds, anomaly))

    preds_ref, anomaly_ref = gdn_reference(x, params)
    assert preds.shape == (B, T, D_OUT) and anomaly.shape == (B, T, D_IN)
    # bf16 MXU operands (f32 accumulation) vs the f32 reference -> loose tolerance.
    assert jnp.allclose(preds, preds_ref, atol=2e-2, rtol=2e-2)
    assert jnp.allclose(anomaly, anomaly_ref, atol=1e-5, rtol=1e-5)

    print("KERNEL_OK")
</pallas_src>

<mosaic_0001>
module attributes {stable_mosaic.version = 11 : i64} {
  func.func @anomaly_kernel(%arg0: i32, %arg1: memref<4x128xf32, #tpu.memory_space<vmem>>, %arg2: memref<1x128xf32, #tpu.memory_space<vmem>>, %arg3: memref<1x128xf32, #tpu.memory_space<vmem>>, %arg4: memref<4x128xf32, #tpu.memory_space<vmem>>) attributes {dimension_semantics = [#tpu.dimension_semantics<parallel>], iteration_bounds = array<i64: 1>, scalar_prefetch = 0 : i64, scratch_operands = 0 : i64, tpu.core_type = #tpu.core_type<tc>, window_params = [{transform_indices = @transform_0, window_bounds = array<i64: 4, 128>}, {pipeline_mode = #tpu.pipeline_mode<synchronous>, transform_indices = @transform_1, window_bounds = array<i64: 1, 128>}, {pipeline_mode = #tpu.pipeline_mode<synchronous>, transform_indices = @transform_2, window_bounds = array<i64: 1, 128>}, {transform_indices = @transform_3, window_bounds = array<i64: 4, 128>}]} {
    %c0 = arith.constant 0 : index
    %c0_0 = arith.constant 0 : index
    %0 = vector.load %arg1[%c0, %c0_0] : memref<4x128xf32, #tpu.memory_space<vmem>>, vector<4x128xf32>
    %c0_1 = arith.constant 0 : index
    %c0_2 = arith.constant 0 : index
    %1 = vector.load %arg2[%c0_1, %c0_2] : memref<1x128xf32, #tpu.memory_space<vmem>>, vector<1x128xf32>
    %2 = vector.broadcast %1 : vector<1x128xf32> to vector<4x128xf32>
    %3 = arith.subf %0, %2 : vector<4x128xf32>
    %c0_3 = arith.constant 0 : index
    %c0_4 = arith.constant 0 : index
    %4 = vector.load %arg3[%c0_3, %c0_4] : memref<1x128xf32, #tpu.memory_space<vmem>>, vector<1x128xf32>
    %5 = vector.broadcast %4 : vector<1x128xf32> to vector<4x128xf32>
    %6 = arith.mulf %3, %5 : vector<4x128xf32>
    %7 = math.absf %6 : vector<4x128xf32>
    %8 = arith.negf %7 : vector<4x128xf32>
    %9 = math.exp %8 : vector<4x128xf32>
    %cst = arith.constant 1.000000e+00 : f32
    %10 = vector.broadcast %cst : f32 to vector<4x128xf32>
    %11 = arith.addf %10, %9 : vector<4x128xf32>
    %12 = arith.divf %10, %11 : vector<4x128xf32>
    %c0_5 = arith.constant 0 : index
    %c0_6 = arith.constant 0 : index
    %13 = vector.load %arg4[%c0_5, %c0_6] : memref<4x128xf32, #tpu.memory_space<vmem>>, vector<4x128xf32>
    tpu.vector_store %arg4[%c0_5, %c0_6], %12 {strides = array<i32>} : memref<4x128xf32, #tpu.memory_space<vmem>>, vector<4x128xf32>,
    return
  }
  func.func @transform_0(%arg0: i32) -> (i32, i32) {
    %c0_i32 = arith.constant 0 : i32
    %c0_i32_0 = arith.constant 0 : i32
    return %arg0, %c0_i32 : i32, i32
  }
  func.func @transform_1(%arg0: i32) -> (i32, i32) {
    %c0_i32 = arith.constant 0 : i32
    %c0_i32_0 = arith.constant 0 : i32
    %c0_i32_1 = arith.constant 0 : i32
    return %c0_i32, %c0_i32_0 : i32, i32
  }
  func.func @transform_2(%arg0: i32) -> (i32, i32) {
    %c0_i32 = arith.constant 0 : i32
    %c0_i32_0 = arith.constant 0 : i32
    %c0_i32_1 = arith.constant 0 : i32
    return %c0_i32, %c0_i32_0 : i32, i32
  }
  func.func @transform_3(%arg0: i32) -> (i32, i32) {
    %c0_i32 = arith.constant 0 : i32
    %c0_i32_0 = arith.constant 0 : i32
    return %arg0, %c0_i32 : i32, i32
  }
}

module attributes {stable_mosaic.version = 11 : i64} {
  func.func @gdn_recurrent_kernel(%arg0: i32, %arg1: memref<8x8x32xf32, #tpu.memory_space<vmem>>, %arg2: memref<32x128xbf16, #tpu.memory_space<vmem>>, %arg3: memref<1x128xf32, #tpu.memory_space<vmem>>, %arg4: memref<128x384xbf16, #tpu.memory_space<vmem>>, %arg5: memref<1x384xf32, #tpu.memory_space<vmem>>, %arg6: memref<128x384xbf16, #tpu.memory_space<vmem>>, %arg7: memref<1x128xf32, #tpu.memory_space<vmem>>, %arg8: memref<128x128xbf16, #tpu.memory_space<vmem>>, %arg9: memref<1x128xf32, #tpu.memory_space<vmem>>, %arg10: memref<8x8x128xf32, #tpu.memory_space<vmem>>, %arg11: memref<64x384xf32, #tpu.memory_space<vmem>>, %arg12: memref<64x128xf32, #tpu.memory_space<vmem>>) attributes {dimension_semantics = [#tpu.dimension_semantics<parallel>], iteration_bounds = array<i64: 1>, scalar_prefetch = 0 : i64, scratch_operands = 2 : i64, tpu.core_type = #tpu.core_type<tc>, window_params = [{transform_indices = @transform_0, window_bounds = array<i64: 8, 8, 32>}, {pipeline_mode = #tpu.pipeline_mode<synchronous>, transform_indices = @transform_1, window_bounds = array<i64: 32, 128>}, {pipeline_mode = #tpu.pipeline_mode<synchronous>, transform_indices = @transform_2, window_bounds = array<i64: 1, 128>}, {pipeline_mode = #tpu.pipeline_mode<synchronous>, transform_indices = @transform_3, window_bounds = array<i64: 128, 384>}, {pipeline_mode = #tpu.pipeline_mode<synchronous>, transform_indices = @transform_4, window_bounds = array<i64: 1, 384>}, {pipeline_mode = #tpu.pipeline_mode<synchronous>, transform_indices = @transform_5, window_bounds = array<i64: 128, 384>}, {pipeline_mode = #tpu.pipeline_mode<synchronous>, transform_indices = @transform_6, window_bounds = array<i64: 1, 128>}, {pipeline_mode = #tpu.pipeline_mode<synchronous>, transform_indices = @transform_7, window_bounds = array<i64: 128, 128>}, {pipeline_mode = #tpu.pipeline_mode<synchronous>, transform_indices = @transform_8, window_bounds = array<i64: 1, 128>}, {transform_indices = @transform_9, window_bounds = array<i64: 8, 8, 128>}]} {
    %c0 = arith.constant 0 : index
    %c0_0 = arith.constant 0 : index
    %c0_1 = arith.constant 0 : index
    %0 = vector.load %arg1[%c0, %c0_0, %c0_1] : memref<8x8x32xf32, #tpu.memory_space<vmem>>, vector<8x8x32xf32>
    %1 = vector.shape_cast %0 : vector<8x8x32xf32> to vector<64x32xf32>
    %2 = arith.truncf %1 : vector<64x32xf32> to vector<64x32xbf16>
    %c0_2 = arith.constant 0 : index
    %c0_3 = arith.constant 0 : index
    %3 = vector.load %arg2[%c0_2, %c0_3] : memref<32x128xbf16, #tpu.memory_space<vmem>>, vector<32x128xbf16>
    %cst = arith.constant dense<0.000000e+00> : vector<64x128xf32>
    %4 = tpu.matmul %2, %3, %cst {dimension_numbers = #tpu.dot_dimension_numbers<[1], [0], [0], [1], [0, 0, 1, 1], [], []>} : vector<64x32xbf16>, vector<32x128xbf16>, vector<64x128xf32> -> vector<64x128xf32>
    %c0_4 = arith.constant 0 : index
    %c0_5 = arith.constant 0 : index
    %5 = vector.load %arg3[%c0_4, %c0_5] : memref<1x128xf32, #tpu.memory_space<vmem>>, vector<1x128xf32>
    %6 = vector.broadcast %5 : vector<1x128xf32> to vector<64x128xf32>
    %7 = arith.addf %4, %6 : vector<64x128xf32>
    %cst_6 = arith.constant 0.000000e+00 : f32
    %8 = vector.broadcast %cst_6 : f32 to vector<64x128xf32>
    %9 = arith.maximumf %7, %8 : vector<64x128xf32>
    %10 = arith.truncf %9 : vector<64x128xf32> to vector<64x128xbf16>
    %c0_7 = arith.constant 0 : index
    %c0_8 = arith.constant 0 : index
    %11 = vector.load %arg4[%c0_7, %c0_8] : memref<128x384xbf16, #tpu.memory_space<vmem>>, vector<128x384xbf16>
    %cst_9 = arith.constant dense<0.000000e+00> : vector<64x384xf32>
    %12 = tpu.matmul %10, %11, %cst_9 {dimension_numbers = #tpu.dot_dimension_numbers<[1], [0], [0], [1], [0, 0, 1, 1], [], []>} : vector<64x128xbf16>, vector<128x384xbf16>, vector<64x384xf32> -> vector<64x384xf32>
    %c0_10 = arith.constant 0 : index
    %c0_11 = arith.constant 0 : index
    %13 = vector.load %arg5[%c0_10, %c0_11] : memref<1x384xf32, #tpu.memory_space<vmem>>, vector<1x384xf32>
    %14 = vector.broadcast %13 : vector<1x384xf32> to vector<64x384xf32>
    %15 = arith.addf %12, %14 : vector<64x384xf32>
    %c0_12 = arith.constant 0 : index
    %c0_13 = arith.constant 0 : index
    %16 = vector.load %arg11[%c0_12, %c0_13] : memref<64x384xf32, #tpu.memory_space<vmem>>, vector<64x384xf32>
    tpu.vector_store %arg11[%c0_12, %c0_13], %15 {strides = array<i32>} : memref<64x384xf32, #tpu.memory_space<vmem>>, vector<64x384xf32>,
    %c0_14 = arith.constant 0 : index
    %c0_15 = arith.constant 0 : index
    %17 = vector.load %arg6[%c0_14, %c0_15] : memref<128x384xbf16, #tpu.memory_space<vmem>>, vector<128x384xbf16>
    %c0_16 = arith.constant 0 : index
    %c0_17 = arith.constant 0 : index
    %18 = vector.load %arg7[%c0_16, %c0_17] : memref<1x128xf32, #tpu.memory_space<vmem>>, vector<1x128xf32>
    %19 = vector.shape_cast %18 : vector<1x128xf32> to vector<1x128xf32>
    %20 = vector.broadcast %19 : vector<1x128xf32> to vector<8x128xf32>
    %cst_18 = arith.constant 0.000000e+00 : f32
    %21 = vector.broadcast %cst_18 : f32 to vector<8x128xf32>
    %c0_i32 = arith.constant 0 : i32
    %c8_i32 = arith.constant 8 : i32
    %22 = arith.muli %c0_i32, %c8_i32 : i32
    %23 = tpu.assume_multiple %22, 8 : i32
    %24 = arith.index_cast %23 : i32 to index
    %c0_19 = arith.constant 0 : index
    %25 = vector.load %arg11[%24, %c0_19] : memref<64x384xf32, #tpu.memory_space<vmem>>, vector<8x384xf32>
    %26 = arith.truncf %21 : vector<8x128xf32> to vector<8x128xbf16>
    %cst_20 = arith.constant dense<0.000000e+00> : vector<8x384xf32>
    %27 = tpu.matmul %26, %17, %cst_20 {dimension_numbers = #tpu.dot_dimension_numbers<[1], [0], [0], [1], [0, 0, 1, 1], [], []>} : vector<8x128xbf16>, vector<128x384xbf16>, vector<8x384xf32> -> vector<8x384xf32>
    %28 = vector.extract_strided_slice %25 {offsets = [0, 0], sizes = [8, 128], strides = [1, 1]} : vector<8x384xf32> to vector<8x128xf32>
    %29 = vector.extract_strided_slice %27 {offsets = [0, 0], sizes = [8, 128], strides = [1, 1]} : vector<8x384xf32> to vector<8x128xf32>
    %30 = arith.addf %28, %29 : vector<8x128xf32>
    %31 = arith.negf %30 : vector<8x128xf32>
    %32 = math.exp %31 : vector<8x128xf32>
    %cst_21 = arith.constant 1.000000e+00 : f32
    %33 = vector.broadcast %cst_21 : f32 to vector<8x128xf32>
    %34 = arith.addf %33, %32 : vector<8x128xf32>
    %35 = arith.divf %33, %34 : vector<8x128xf32>
    %36 = vector.extract_strided_slice %25 {offsets = [0, 128], sizes = [8, 128], strides = [1, 1]} : vector<8x384xf32> to vector<8x128xf32>
    %37 = vector.extract_strided_slice %27 {offsets = [0, 128], sizes = [8, 128], strides = [1, 1]} : vector<8x384xf32> to vector<8x128xf32>
    %38 = arith.addf %36, %37 : vector<8x128xf32>
    %39 = arith.negf %38 : vector<8x128xf32>
    %40 = math.exp %39 : vector<8x128xf32>
    %cst_22 = arith.constant 1.000000e+00 : f32
    %41 = vector.broadcast %cst_22 : f32 to vector<8x128xf32>
    %42 = arith.addf %41, %40 : vector<8x128xf32>
    %43 = arith.divf %41, %42 : vector<8x128xf32>
    %44 = vector.extract_strided_slice %25 {offsets = [0, 256], sizes = [8, 128], strides = [1, 1]} : vector<8x384xf32> to vector<8x128xf32>
    %45 = vector.extract_strided_slice %27 {offsets = [0, 256], sizes = [8, 128], strides = [1, 1]} : vector<8x384xf32> to vector<8x128xf32>
    %46 = arith.addf %45, %20 : vector<8x128xf32>
    %47 = arith.mulf %35, %46 : vector<8x128xf32>
    %48 = arith.addf %44, %47 : vector<8x128xf32>
    %49 = math.tanh %48 : vector<8x128xf32>
    %cst_23 = arith.constant 1.000000e+00 : f32
    %50 = vector.broadcast %cst_23 : f32 to vector<8x128xf32>
    %51 = arith.subf %50, %43 : vector<8x128xf32>
    %52 = arith.mulf %51, %49 : vector<8x128xf32>
    %53 = arith.mulf %43, %21 : vector<8x128xf32>
    %54 = arith.addf %52, %53 : vector<8x128xf32>
    %55 = arith.index_cast %23 : i32 to index
    %c0_24 = arith.constant 0 : index
    %56 = vector.load %arg12[%55, %c0_24] : memref<64x128xf32, #tpu.memory_space<vmem>>, vector<8x128xf32>
    tpu.vector_store %arg12[%55, %c0_24], %54 {strides = array<i32>} : memref<64x128xf32, #tpu.memory_space<vmem>>, vector<8x128xf32>,
    %c1_i32 = arith.constant 1 : i32
    %c8_i32_25 = arith.constant 8 : i32
    %57 = arith.muli %c1_i32, %c8_i32_25 : i32
    %58 = tpu.assume_multiple %57, 8 : i32
    %59 = arith.index_cast %58 : i32 to index
    %c0_26 = arith.constant 0 : index
    %60 = vector.load %arg11[%59, %c0_26] : memref<64x384xf32, #tpu.memory_space<vmem>>, vector<8x384xf32>
    %61 = arith.truncf %54 : vector<8x128xf32> to vector<8x128xbf16>
    %cst_27 = arith.constant dense<0.000000e+00> : vector<8x384xf32>
    %62 = tpu.matmul %61, %17, %cst_27 {dimension_numbers = #tpu.dot_dimension_numbers<[1], [0], [0], [1], [0, 0, 1, 1], [], []>} : vector<8x128xbf16>, vector<128x384xbf16>, vector<8x384xf32> -> vector<8x384xf32>
    %63 = vector.extract_strided_slice %60 {offsets = [0, 0], sizes = [8, 128], strides = [1, 1]} : vector<8x384xf32> to vector<8x128xf32>
    %64 = vector.extract_strided_slice %62 {offsets = [0, 0], sizes = [8, 128], strides = [1, 1]} : vector<8x384xf32> to vector<8x128xf32>
    %65 = arith.addf %63, %64 : vector<8x128xf32>
    %66 = arith.negf %65 : vector<8x128xf32>
    %67 = math.exp %66 : vector<8x128xf32>
    %cst_28 = arith.constant 1.000000e+00 : f32
    %68 = vector.broadcast %cst_28 : f32 to vector<8x128xf32>
    %69 = arith.addf %68, %67 : vector<8x128xf32>
    %70 = arith.divf %68, %69 : vector<8x128xf32>
    %71 = vector.extract_strided_slice %60 {offsets = [0, 128], sizes = [8, 128], strides = [1, 1]} : vector<8x384xf32> to vector<8x128xf32>
    %72 = vector.extract_strided_slice %62 {offsets = [0, 128], sizes = [8, 128], strides = [1, 1]} : vector<8x384xf32> to vector<8x128xf32>
    %73 = arith.addf %71, %72 : vector<8x128xf32>
    %74 = arith.negf %73 : vector<8x128xf32>
    %75 = math.exp %74 : vector<8x128xf32>
    %cst_29 = arith.constant 1.000000e+00 : f32
    %76 = vector.broadcast %cst_29 : f32 to vector<8x128xf32>
    %77 = arith.addf %76, %75 : vector<8x128xf32>
    %78 = arith.divf %76, %77 : vector<8x128xf32>
    %79 = vector.extract_strided_slice %60 {offsets = [0, 256], sizes = [8, 128], strides = [1, 1]} : vector<8x384xf32> to vector<8x128xf32>
    %80 = vector.extract_strided_slice %62 {offsets = [0, 256], sizes = [8, 128], strides = [1, 1]} : vector<8x384xf32> to vector<8x128xf32>
    %81 = arith.addf %80, %20 : vector<8x128xf32>
    %82 = arith.mulf %70, %81 : vector<8x128xf32>
    %83 = arith.addf %79, %82 : vector<8x128xf32>
    %84 = math.tanh %83 : vector<8x128xf32>
    %cst_30 = arith.constant 1.000000e+00 : f32
    %85 = vector.broadcast %cst_30 : f32 to vector<8x128xf32>
    %86 = arith.subf %85, %78 : vector<8x128xf32>
    %87 = arith.mulf %86, %84 : vector<8x128xf32>
    %88 = arith.mulf %78, %54 : vector<8x128xf32>
    %89 = arith.addf %87, %88 : vector<8x128xf32>
    %90 = arith.index_cast %58 : i32 to index
    %c0_31 = arith.constant 0 : index
    %91 = vector.load %arg12[%90, %c0_31] : memref<64x128xf32, #tpu.memory_space<vmem>>, vector<8x128xf32>
    tpu.vector_store %arg12[%90, %c0_31], %89 {strides = array<i32>} : memref<64x128xf32, #tpu.memory_space<vmem>>, vector<8x128xf32>,
    %c2_i32 = arith.constant 2 : i32
    %c8_i32_32 = arith.constant 8 : i32
    %92 = arith.muli %c2_i32, %c8_i32_32 : i32
    %93 = tpu.assume_multiple %92, 8 : i32
    %94 = arith.index_cast %93 : i32 to index
    %c0_33 = arith.constant 0 : index
    %95 = vector.load %arg11[%94, %c0_33] : memref<64x384xf32, #tpu.memory_space<vmem>>, vector<8x384xf32>
    %96 = arith.truncf %89 : vector<8x128xf32> to vector<8x128xbf16>
    %cst_34 = arith.constant dense<0.000000e+00> : vector<8x384xf32>
    %97 = tpu.matmul %96, %17, %cst_34 {dimension_numbers = #tpu.dot_dimension_numbers<[1], [0], [0], [1], [0, 0, 1, 1], [], []>} : vector<8x128xbf16>, vector<128x384xbf16>, vector<8x384xf32> -> vector<8x384xf32>
    %98 = vector.extract_strided_slice %95 {offsets = [0, 0], sizes = [8, 128], strides = [1, 1]} : vector<8x384xf32> to vector<8x128xf32>
    %99 = vector.extract_strided_slice %97 {offsets = [0, 0], sizes = [8, 128], strides = [1, 1]} : vector<8x384xf32> to vector<8x128xf32>
    %100 = arith.addf %98, %99 : vector<8x128xf32>
    %101 = arith.negf %100 : vector<8x128xf32>
    %102 = math.exp %101 : vector<8x128xf32>
    %cst_35 = arith.constant 1.000000e+00 : f32
    %103 = vector.broadcast %cst_35 : f32 to vector<8x128xf32>
    %104 = arith.addf %103, %102 : vector<8x128xf32>
    %105 = arith.divf %103, %104 : vector<8x128xf32>
    %106 = vector.extract_strided_slice %95 {offsets = [0, 128], sizes = [8, 128], strides = [1, 1]} : vector<8x384xf32> to vector<8x128xf32>
    %107 = vector.extract_strided_slice %97 {offsets = [0, 128], sizes = [8, 128], strides = [1, 1]} : vector<8x384xf32> to vector<8x128xf32>
    %108 = arith.addf %106, %107 : vector<8x128xf32>
    %109 = arith.negf %108 : vector<8x128xf32>
    %110 = math.exp %109 : vector<8x128xf32>
    %cst_36 = arith.constant 1.000000e+00 : f32
    %111 = vector.broadcast %cst_36 : f32 to vector<8x128xf32>
    %112 = arith.addf %111, %110 : vector<8x128xf32>
    %113 = arith.divf %111, %112 : vector<8x128xf32>
    %114 = vector.extract_strided_slice %95 {offsets = [0, 256], sizes = [8, 128], strides = [1, 1]} : vector<8x384xf32> to vector<8x128xf32>
    %115 = vector.extract_strided_slice %97 {offsets = [0, 256], sizes = [8, 128], strides = [1, 1]} : vector<8x384xf32> to vector<8x128xf32>
    %116 = arith.addf %115, %20 : vector<8x128xf32>
    %117 = arith.mulf %105, %116 : vector<8x128xf32>
    %118 = arith.addf %114, %117 : vector<8x128xf32>
    %119 = math.tanh %118 : vector<8x128xf32>
    %cst_37 = arith.constant 1.000000e+00 : f32
    %120 = vector.broadcast %cst_37 : f32 to vector<8x128xf32>
    %121 = arith.subf %120, %113 : vector<8x128xf32>
    %122 = arith.mulf %121, %119 : vector<8x128xf32>
    %123 = arith.mulf %113, %89 : vector<8x128xf32>
    %124 = arith.addf %122, %123 : vector<8x128xf32>
    %125 = arith.index_cast %93 : i32 to index
    %c0_38 = arith.constant 0 : index
    %126 = vector.load %arg12[%125, %c0_38] : memref<64x128xf32, #tpu.memory_space<vmem>>, vector<8x128xf32>
    tpu.vector_store %arg12[%125, %c0_38], %124 {strides = array<i32>} : memref<64x128xf32, #tpu.memory_space<vmem>>, vector<8x128xf32>,
    %c3_i32 = arith.constant 3 : i32
    %c8_i32_39 = arith.constant 8 : i32
    %127 = arith.muli %c3_i32, %c8_i32_39 : i32
    %128 = tpu.assume_multiple %127, 8 : i32
    %129 = arith.index_cast %128 : i32 to index
    %c0_40 = arith.constant 0 : index
    %130 = vector.load %arg11[%129, %c0_40] : memref<64x384xf32, #tpu.memory_space<vmem>>, vector<8x384xf32>
    %131 = arith.truncf %124 : vector<8x128xf32> to vector<8x128xbf16>
    %cst_41 = arith.constant dense<0.000000e+00> : vector<8x384xf32>
    %132 = tpu.matmul %131, %17, %cst_41 {dimension_numbers = #tpu.dot_dimension_numbers<[1], [0], [0], [1], [0, 0, 1, 1], [], []>} : vector<8x128xbf16>, vector<128x384xbf16>, vector<8x384xf32> -> vector<8x384xf32>
    %133 = vector.extract_strided_slice %130 {offsets = [0, 0], sizes = [8, 128], strides = [1, 1]} : vector<8x384xf32> to vector<8x128xf32>
    %134 = vector.extract_strided_slice %132 {offsets = [0, 0], sizes = [8, 128], strides = [1, 1]} : vector<8x384xf32> to vector<8x128xf32>
    %135 = arith.addf %133, %134 : vector<8x128xf32>
    %136 = arith.negf %135 : vector<8x128xf32>
    %137 = math.exp %136 : vector<8x128xf32>
    %cst_42 = arith.constant 1.000000e+00 : f32
    %138 = vector.broadcast %cst_42 : f32 to vector<8x128xf32>
    %139 = arith.addf %138, %137 : vector<8x128xf32>
    %140 = arith.divf %138, %139 : vector<8x128xf32>
    %141 = vector.extract_strided_slice %130 {offsets = [0, 128], sizes = [8, 128], strides = [1, 1]} : vector<8x384xf32> to vector<8x128xf32>
    %142 = vector.extract_strided_slice %132 {offsets = [0, 128], sizes = [8, 128], strides = [1, 1]} : vector<8x384xf32> to vector<8x128xf32>
    %143 = arith.addf %141, %142 : vector<8x128xf32>
    %144 = arith.negf %143 : vector<8x128xf32>
    %145 = math.exp %144 : vector<8x128xf32>
    %cst_43 = arith.constant 1.000000e+00 : f32
    %146 = vector.broadcast %cst_43 : f32 to vector<8x128xf32>
    %147 = arith.addf %146, %145 : vector<8x128xf32>
    %148 = arith.divf %146, %147 : vector<8x128xf32>
    %149 = vector.extract_strided_slice %130 {offsets = [0, 256], sizes = [8, 128], strides = [1, 1]} : vector<8x384xf32> to vector<8x128xf32>
    %150 = vector.extract_strided_slice %132 {offsets = [0, 256], sizes = [8, 128], strides = [1, 1]} : vector<8x384xf32> to vector<8x128xf32>
    %151 = arith.addf %150, %20 : vector<8x128xf32>
    %152 = arith.mulf %140, %151 : vector<8x128xf32>
    %153 = arith.addf %149, %152 : vector<8x128xf32>
    %154 = math.tanh %153 : vector<8x128xf32>
    %cst_44 = arith.constant 1.000000e+00 : f32
    %155 = vector.broadcast %cst_44 : f32 to vector<8x128xf32>
    %156 = arith.subf %155, %148 : vector<8x128xf32>
    %157 = arith.mulf %156, %154 : vector<8x128xf32>
    %158 = arith.mulf %148, %124 : vector<8x128xf32>
    %159 = arith.addf %157, %158 : vector<8x128xf32>
    %160 = arith.index_cast %128 : i32 to index
    %c0_45 = arith.constant 0 : index
    %161 = vector.load %arg12[%160, %c0_45] : memref<64x128xf32, #tpu.memory_space<vmem>>, vector<8x128xf32>
    tpu.vector_store %arg12[%160, %c0_45], %159 {strides = array<i32>} : memref<64x128xf32, #tpu.memory_space<vmem>>, vector<8x128xf32>,
    %c4_i32 = arith.constant 4 : i32
    %c8_i32_46 = arith.constant 8 : i32
    %162 = arith.muli %c4_i32, %c8_i32_46 : i32
    %163 = tpu.assume_multiple %162, 8 : i32
    %164 = arith.index_cast %163 : i32 to index
    %c0_47 = arith.constant 0 : index
    %165 = vector.load %arg11[%164, %c0_47] : memref<64x384xf32, #tpu.memory_space<vmem>>, vector<8x384xf32>
    %166 = arith.truncf %159 : vector<8x128xf32> to vector<8x128xbf16>
    %cst_48 = arith.constant dense<0.000000e+00> : vector<8x384xf32>
    %167 = tpu.matmul %166, %17, %cst_48 {dimension_numbers = #tpu.dot_dimension_numbers<[1], [0], [0], [1], [0, 0, 1, 1], [], []>} : vector<8x128xbf16>, vector<128x384xbf16>, vector<8x384xf32> -> vector<8x384xf32>
    %168 = vector.extract_strided_slice %165 {offsets = [0, 0], sizes = [8, 128], strides = [1, 1]} : vector<8x384xf32> to vector<8x128xf32>
    %169 = vector.extract_strided_slice %167 {offsets = [0, 0], sizes = [8, 128], strides = [1, 1]} : vector<8x384xf32> to vector<8x128xf32>
    %170 = arith.addf %168, %169 : vector<8x128xf32>
    %171 = arith.negf %170 : vector<8x128xf32>
    %172 = math.exp %171 : vector<8x128xf32>
    %cst_49 = arith.constant 1.000000e+00 : f32
    %173 = vector.broadcast %cst_49 : f32 to vector<8x128xf32>
    %174 = arith.addf %173, %172 : vector<8x128xf32>
    %175 = arith.divf %173, %174 : vector<8x128xf32>
    %176 = vector.extract_strided_slice %165 {offsets = [0, 128], sizes = [8, 128], strides = [1, 1]} : vector<8x384xf32> to vector<8x128xf32>
    %177 = vector.extract_strided_slice %167 {offsets = [0, 128], sizes = [8, 128], strides = [1, 1]} : vector<8x384xf32> to vector<8x128xf32>
    %178 = arith.addf %176, %177 : vector<8x128xf32>
    %179 = arith.negf %178 : vector<8x128xf32>
    %180 = math.exp %179 : vector<8x128xf32>
    %cst_50 = arith.constant 1.000000e+00 : f32
    %181 = vector.broadcast %cst_50 : f32 to vector<8x128xf32>
    %182 = arith.addf %181, %180 : vector<8x128xf32>
    %183 = arith.divf %181, %182 : vector<8x128xf32>
    %184 = vector.extract_strided_slice %165 {offsets = [0, 256], sizes = [8, 128], strides = [1, 1]} : vector<8x384xf32> to vector<8x128xf32>
    %185 = vector.extract_strided_slice %167 {offsets = [0, 256], sizes = [8, 128], strides = [1, 1]} : vector<8x384xf32> to vector<8x128xf32>
    %186 = arith.addf %185, %20 : vector<8x128xf32>
    %187 = arith.mulf %175, %186 : vector<8x128xf32>
    %188 = arith.addf %184, %187 : vector<8x128xf32>
    %189 = math.tanh %188 : vector<8x128xf32>
    %cst_51 = arith.constant 1.000000e+00 : f32
    %190 = vector.broadcast %cst_51 : f32 to vector<8x128xf32>
    %191 = arith.subf %190, %183 : vector<8x128xf32>
    %192 = arith.mulf %191, %189 : vector<8x128xf32>
    %193 = arith.mulf %183, %159 : vector<8x128xf32>
    %194 = arith.addf %192, %193 : vector<8x128xf32>
    %195 = arith.index_cast %163 : i32 to index
    %c0_52 = arith.constant 0 : index
    %196 = vector.load %arg12[%195, %c0_52] : memref<64x128xf32, #tpu.memory_space<vmem>>, vector<8x128xf32>
    tpu.vector_store %arg12[%195, %c0_52], %194 {strides = array<i32>} : memref<64x128xf32, #tpu.memory_space<vmem>>, vector<8x128xf32>,
    %c5_i32 = arith.constant 5 : i32
    %c8_i32_53 = arith.constant 8 : i32
    %197 = arith.muli %c5_i32, %c8_i32_53 : i32
    %198 = tpu.assume_multiple %197, 8 : i32
    %199 = arith.index_cast %198 : i32 to index
    %c0_54 = arith.constant 0 : index
    %200 = vector.load %arg11[%199, %c0_54] : memref<64x384xf32, #tpu.memory_space<vmem>>, vector<8x384xf32>
    %201 = arith.truncf %194 : vector<8x128xf32> to vector<8x128xbf16>
    %cst_55 = arith.constant dense<0.000000e+00> : vector<8x384xf32>
    %202 = tpu.matmul %201, %17, %cst_55 {dimension_numbers = #tpu.dot_dimension_numbers<[1], [0], [0], [1], [0, 0, 1, 1], [], []>} : vector<8x128xbf16>, vector<128x384xbf16>, vector<8x384xf32> -> vector<8x384xf32>
    %203 = vector.extract_strided_slice %200 {offsets = [0, 0], sizes = [8, 128], strides = [1, 1]} : vector<8x384xf32> to vector<8x128xf32>
    %204 = vector.extract_strided_slice %202 {offsets = [0, 0], sizes = [8, 128], strides = [1, 1]} : vector<8x384xf32> to vector<8x128xf32>
    %205 = arith.addf %203, %204 : vector<8x128xf32>
    %206 = arith.negf %205 : vector<8x128xf32>
    %207 = math.exp %206 : vector<8x128xf32>
    %cst_56 = arith.constant 1.000000e+00 : f32
    %208 = vector.broadcast %cst_56 : f32 to vector<8x128xf32>
    %209 = arith.addf %208, %207 : vector<8x128xf32>
    %210 = arith.divf %208, %209 : vector<8x128xf32>
    %211 = vector.extract_strided_slice %200 {offsets = [0, 128], sizes = [8, 128], strides = [1, 1]} : vector<8x384xf32> to vector<8x128xf32>
    %212 = vector.extract_strided_slice %202 {offsets = [0, 128], sizes = [8, 128], strides = [1, 1]} : vector<8x384xf32> to vector<8x128xf32>
    %213 = arith.addf %211, %212 : vector<8x128xf32>
    %214 = arith.negf %213 : vector<8x128xf32>
    %215 = math.exp %214 : vector<8x128xf32>
    %cst_57 = arith.constant 1.000000e+00 : f32
    %216 = vector.broadcast %cst_57 : f32 to vector<8x128xf32>
    %217 = arith.addf %216, %215 : vector<8x128xf32>
    %218 = arith.divf %216, %217 : vector<8x128xf32>
    %219 = vector.extract_strided_slice %200 {offsets = [0, 256], sizes = [8, 128], strides = [1, 1]} : vector<8x384xf32> to vector<8x128xf32>
    %220 = vector.extract_strided_slice %202 {offsets = [0, 256], sizes = [8, 128], strides = [1, 1]} : vector<8x384xf32> to vector<8x128xf32>
    %221 = arith.addf %220, %20 : vector<8x128xf32>
    %222 = arith.mulf %210, %221 : vector<8x128xf32>
    %223 = arith.addf %219, %222 : vector<8x128xf32>
    %224 = math.tanh %223 : vector<8x128xf32>
    %cst_58 = arith.constant 1.000000e+00 : f32
    %225 = vector.broadcast %cst_58 : f32 to vector<8x128xf32>
    %226 = arith.subf %225, %218 : vector<8x128xf32>
    %227 = arith.mulf %226, %224 : vector<8x128xf32>
    %228 = arith.mulf %218, %194 : vector<8x128xf32>
    %229 = arith.addf %227, %228 : vector<8x128xf32>
    %230 = arith.index_cast %198 : i32 to index
    %c0_59 = arith.constant 0 : index
    %231 = vector.load %arg12[%230, %c0_59] : memref<64x128xf32, #tpu.memory_space<vmem>>, vector<8x128xf32>
    tpu.vector_store %arg12[%230, %c0_59], %229 {strides = array<i32>} : memref<64x128xf32, #tpu.memory_space<vmem>>, vector<8x128xf32>,
    %c6_i32 = arith.constant 6 : i32
    %c8_i32_60 = arith.constant 8 : i32
    %232 = arith.muli %c6_i32, %c8_i32_60 : i32
    %233 = tpu.assume_multiple %232, 8 : i32
    %234 = arith.index_cast %233 : i32 to index
    %c0_61 = arith.constant 0 : index
    %235 = vector.load %arg11[%234, %c0_61] : memref<64x384xf32, #tpu.memory_space<vmem>>, vector<8x384xf32>
    %236 = arith.truncf %229 : vector<8x128xf32> to vector<8x128xbf16>
    %cst_62 = arith.constant dense<0.000000e+00> : vector<8x384xf32>
    %237 = tpu.matmul %236, %17, %cst_62 {dimension_numbers = #tpu.dot_dimension_numbers<[1], [0], [0], [1], [0, 0, 1, 1], [], []>} : vector<8x128xbf16>, vector<128x384xbf16>, vector<8x384xf32> -> vector<8x384xf32>
    %238 = vector.extract_strided_slice %235 {offsets = [0, 0], sizes = [8, 128], strides = [1, 1]} : vector<8x384xf32> to vector<8x128xf32>
    %239 = vector.extract_strided_slice %237 {offsets = [0, 0], sizes = [8, 128], strides = [1, 1]} : vector<8x384xf32> to vector<8x128xf32>
    %240 = arith.addf %238, %239 : vector<8x128xf32>
    %241 = arith.negf %240 : vector<8x128xf32>
    %242 = math.exp %241 : vector<8x128xf32>
    %cst_63 = arith.constant 1.000000e+00 : f32
    %243 = vector.broadcast %cst_63 : f32 to vector<8x128xf32>
    %244 = arith.addf %243, %242 : vector<8x128xf32>
    %245 = arith.divf %243, %244 : vector<8x128xf32>
    %246 = vector.extract_strided_slice %235 {offsets = [0, 128], sizes = [8, 128], strides = [1, 1]} : vector<8x384xf32> to vector<8x128xf32>
    %247 = vector.extract_strided_slice %237 {offsets = [0, 128], sizes = [8, 128], strides = [1, 1]} : vector<8x384xf32> to vector<8x128xf32>
    %248 = arith.addf %246, %247 : vector<8x128xf32>
    %249 = arith.negf %248 : vector<8x128xf32>
    %250 = math.exp %249 : vector<8x128xf32>
    %cst_64 = arith.constant 1.000000e+00 : f32
    %251 = vector.broadcast %cst_64 : f32 to vector<8x128xf32>
    %252 = arith.addf %251, %250 : vector<8x128xf32>
    %253 = arith.divf %251, %252 : vector<8x128xf32>
    %254 = vector.extract_strided_slice %235 {offsets = [0, 256], sizes = [8, 128], strides = [1, 1]} : vector<8x384xf32> to vector<8x128xf32>
    %255 = vector.extract_strided_slice %237 {offsets = [0, 256], sizes = [8, 128], strides = [1, 1]} : vector<8x384xf32> to vector<8x128xf32>
    %256 = arith.addf %255, %20 : vector<8x128xf32>
    %257 = arith.mulf %245, %256 : vector<8x128xf32>
    %258 = arith.addf %254, %257 : vector<8x128xf32>
    %259 = math.tanh %258 : vector<8x128xf32>
    %cst_65 = arith.constant 1.000000e+00 : f32
    %260 = vector.broadcast %cst_65 : f32 to vector<8x128xf32>
    %261 = arith.subf %260, %253 : vector<8x128xf32>
    %262 = arith.mulf %261, %259 : vector<8x128xf32>
    %263 = arith.mulf %253, %229 : vector<8x128xf32>
    %264 = arith.addf %262, %263 : vector<8x128xf32>
    %265 = arith.index_cast %233 : i32 to index
    %c0_66 = arith.constant 0 : index
    %266 = vector.load %arg12[%265, %c0_66] : memref<64x128xf32, #tpu.memory_space<vmem>>, vector<8x128xf32>
    tpu.vector_store %arg12[%265, %c0_66], %264 {strides = array<i32>} : memref<64x128xf32, #tpu.memory_space<vmem>>, vector<8x128xf32>,
    %c7_i32 = arith.constant 7 : i32
    %c8_i32_67 = arith.constant 8 : i32
    %267 = arith.muli %c7_i32, %c8_i32_67 : i32
    %268 = tpu.assume_multiple %267, 8 : i32
    %269 = arith.index_cast %268 : i32 to index
    %c0_68 = arith.constant 0 : index
    %270 = vector.load %arg11[%269, %c0_68] : memref<64x384xf32, #tpu.memory_space<vmem>>, vector<8x384xf32>
    %271 = arith.truncf %264 : vector<8x128xf32> to vector<8x128xbf16>
    %cst_69 = arith.constant dense<0.000000e+00> : vector<8x384xf32>
    %272 = tpu.matmul %271, %17, %cst_69 {dimension_numbers = #tpu.dot_dimension_numbers<[1], [0], [0], [1], [0, 0, 1, 1], [], []>} : vector<8x128xbf16>, vector<128x384xbf16>, vector<8x384xf32> -> vector<8x384xf32>
    %273 = vector.extract_strided_slice %270 {offsets = [0, 0], sizes = [8, 128], strides = [1, 1]} : vector<8x384xf32> to vector<8x128xf32>
    %274 = vector.extract_strided_slice %272 {offsets = [0, 0], sizes = [8, 128], strides = [1, 1]} : vector<8x384xf32> to vector<8x128xf32>
    %275 = arith.addf %273, %274 : vector<8x128xf32>
    %276 = arith.negf %275 : vector<8x128xf32>
    %277 = math.exp %276 : vector<8x128xf32>
    %cst_70 = arith.constant 1.000000e+00 : f32
    %278 = vector.broadcast %cst_70 : f32 to vector<8x128xf32>
    %279 = arith.addf %278, %277 : vector<8x128xf32>
    %280 = arith.divf %278, %279 : vector<8x128xf32>
    %281 = vector.extract_strided_slice %270 {offsets = [0, 128], sizes = [8, 128], strides = [1, 1]} : vector<8x384xf32> to vector<8x128xf32>
    %282 = vector.extract_strided_slice %272 {offsets = [0, 128], sizes = [8, 128], strides = [1, 1]} : vector<8x384xf32> to vector<8x128xf32>
    %283 = arith.addf %281, %282 : vector<8x128xf32>
    %284 = arith.negf %283 : vector<8x128xf32>
    %285 = math.exp %284 : vector<8x128xf32>
    %cst_71 = arith.constant 1.000000e+00 : f32
    %286 = vector.broadcast %cst_71 : f32 to vector<8x128xf32>
    %287 = arith.addf %286, %285 : vector<8x128xf32>
    %288 = arith.divf %286, %287 : vector<8x128xf32>
    %289 = vector.extract_strided_slice %270 {offsets = [0, 256], sizes = [8, 128], strides = [1, 1]} : vector<8x384xf32> to vector<8x128xf32>
    %290 = vector.extract_strided_slice %272 {offsets = [0, 256], sizes = [8, 128], strides = [1, 1]} : vector<8x384xf32> to vector<8x128xf32>
    %291 = arith.addf %290, %20 : vector<8x128xf32>
    %292 = arith.mulf %280, %291 : vector<8x128xf32>
    %293 = arith.addf %289, %292 : vector<8x128xf32>
    %294 = math.tanh %293 : vector<8x128xf32>
    %cst_72 = arith.constant 1.000000e+00 : f32
    %295 = vector.broadcast %cst_72 : f32 to vector<8x128xf32>
    %296 = arith.subf %295, %288 : vector<8x128xf32>
    %297 = arith.mulf %296, %294 : vector<8x128xf32>
    %298 = arith.mulf %288, %264 : vector<8x128xf32>
    %299 = arith.addf %297, %298 : vector<8x128xf32>
    %300 = arith.index_cast %268 : i32 to index
    %c0_73 = arith.constant 0 : index
    %301 = vector.load %arg12[%300, %c0_73] : memref<64x128xf32, #tpu.memory_space<vmem>>, vector<8x128xf32>
    tpu.vector_store %arg12[%300, %c0_73], %299 {strides = array<i32>} : memref<64x128xf32, #tpu.memory_space<vmem>>, vector<8x128xf32>,
    %c8_i32_74 = arith.constant 8 : i32
    %c0_75 = arith.constant 0 : index
    %c0_76 = arith.constant 0 : index
    %302 = vector.load %arg12[%c0_75, %c0_76] : memref<64x128xf32, #tpu.memory_space<vmem>>, vector<64x128xf32>
    %303 = arith.truncf %302 : vector<64x128xf32> to vector<64x128xbf16>
    %c0_77 = arith.constant 0 : index
    %c0_78 = arith.constant 0 : index
    %304 = vector.load %arg8[%c0_77, %c0_78] : memref<128x128xbf16, #tpu.memory_space<vmem>>, vector<128x128xbf16>
    %cst_79 = arith.constant dense<0.000000e+00> : vector<64x128xf32>
    %305 = tpu.matmul %303, %304, %cst_79 {dimension_numbers = #tpu.dot_dimension_numbers<[1], [0], [0], [1], [0, 0, 1, 1], [], []>} : vector<64x128xbf16>, vector<128x128xbf16>, vector<64x128xf32> -> vector<64x128xf32>
    %c0_80 = arith.constant 0 : index
    %c0_81 = arith.constant 0 : index
    %306 = vector.load %arg9[%c0_80, %c0_81] : memref<1x128xf32, #tpu.memory_space<vmem>>, vector<1x128xf32>
    %307 = vector.broadcast %306 : vector<1x128xf32> to vector<64x128xf32>
    %308 = arith.addf %305, %307 : vector<64x128xf32>
    %309 = arith.negf %308 : vector<64x128xf32>
    %310 = math.exp %309 : vector<64x128xf32>
    %cst_82 = arith.constant 1.000000e+00 : f32
    %311 = vector.broadcast %cst_82 : f32 to vector<64x128xf32>
    %312 = arith.addf %311, %310 : vector<64x128xf32>
    %313 = arith.divf %311, %312 : vector<64x128xf32>
    %314 = vector.shape_cast %313 : vector<64x128xf32> to vector<8x8x128xf32>
    %c0_83 = arith.constant 0 : index
    %c0_84 = arith.constant 0 : index
    %c0_85 = arith.constant 0 : index
    %315 = vector.load %arg10[%c0_83, %c0_84, %c0_85] : memref<8x8x128xf32, #tpu.memory_space<vmem>>, vector<8x8x128xf32>
    tpu.vector_store %arg10[%c0_83, %c0_84, %c0_85], %314 {strides = array<i32>} : memref<8x8x128xf32, #tpu.memory_space<vmem>>, vector<8x8x128xf32>,
    return
  }
  func.func @transform_0(%arg0: i32) -> (i32, i32, i32) {
    %c0_i32 = arith.constant 0 : i32
    %c0_i32_0 = arith.constant 0 : i32
    %c0_i32_1 = arith.constant 0 : i32
    return %c0_i32, %arg0, %c0_i32_0 : i32, i32, i32
  }
  func.func @transform_1(%arg0: i32) -> (i32, i32) {
    %c0_i32 = arith.constant 0 : i32
    %c0_i32_0 = arith.constant 0 : i32
    %c0_i32_1 = arith.constant 0 : i32
    return %c0_i32, %c0_i32_0 : i32, i32
  }
  func.func @transform_2(%arg0: i32) -> (i32, i32) {
    %c0_i32 = arith.constant 0 : i32
    %c0_i32_0 = arith.constant 0 : i32
    %c0_i32_1 = arith.constant 0 : i32
    return %c0_i32, %c0_i32_0 : i32, i32
  }
  func.func @transform_3(%arg0: i32) -> (i32, i32) {
    %c0_i32 = arith.constant 0 : i32
    %c0_i32_0 = arith.constant 0 : i32
    %c0_i32_1 = arith.constant 0 : i32
    return %c0_i32, %c0_i32_0 : i32, i32
  }
  func.func @transform_4(%arg0: i32) -> (i32, i32) {
    %c0_i32 = arith.constant 0 : i32
    %c0_i32_0 = arith.constant 0 : i32
    %c0_i32_1 = arith.constant 0 : i32
    return %c0_i32, %c0_i32_0 : i32, i32
  }
  func.func @transform_5(%arg0: i32) -> (i32, i32) {
    %c0_i32 = arith.constant 0 : i32
    %c0_i32_0 = arith.constant 0 : i32
    %c0_i32_1 = arith.constant 0 : i32
    return %c0_i32, %c0_i32_0 : i32, i32
  }
  func.func @transform_6(%arg0: i32) -> (i32, i32) {
    %c0_i32 = arith.constant 0 : i32
    %c0_i32_0 = arith.constant 0 : i32
    %c0_i32_1 = arith.constant 0 : i32
    return %c0_i32, %c0_i32_0 : i32, i32
  }
  func.func @transform_7(%arg0: i32) -> (i32, i32) {
    %c0_i32 = arith.constant 0 : i32
    %c0_i32_0 = arith.constant 0 : i32
    %c0_i32_1 = arith.constant 0 : i32
    return %c0_i32, %c0_i32_0 : i32, i32
  }
  func.func @transform_8(%arg0: i32) -> (i32, i32) {
    %c0_i32 = arith.constant 0 : i32
    %c0_i32_0 = arith.constant 0 : i32
    %c0_i32_1 = arith.constant 0 : i32
    return %c0_i32, %c0_i32_0 : i32, i32
  }
  func.func @transform_9(%arg0: i32) -> (i32, i32, i32) {
    %c0_i32 = arith.constant 0 : i32
    %c0_i32_0 = arith.constant 0 : i32
    %c0_i32_1 = arith.constant 0 : i32
    return %c0_i32, %arg0, %c0_i32_0 : i32, i32, i32
  }
}

</mosaic_0001>

<bundles_post_ra>
// kernel: gdn_forward.2
= control target key start
LH: loop header
LB: loop body
LE: loop exit
PB: predicated region body
PF: predicated region fallthrough
CT: control target
= control target key end

     0   :  { %s82_s0 = inlined_call_operand.vmem [shape: f32[4,128], index: 0, kind: input, shape index: {}]   ;;  %s83_s1 = inlined_call_operand.vmem [shape: f32[1,128], index: 1, kind: input, shape index: {}]   ;;  %s84_s2 = inlined_call_operand.vmem [shape: f32[1,128], index: 2, kind: input, shape index: {}]   ;;  %s85_s3 = inlined_call_operand.vmem [shape: f32[4,128], index: 3, kind: output, shape index: {}]  }
   0x1   :  { %v14_v0 = vld [vmem:[%s82_s0] sm:$0xf] }
   0x2   :  { %v43_v1 = vld [vmem:[%s83_s1] ss:$0 sm:$0xff] }
   0x3   :  { %v44_v2 = vld [vmem:[%s84_s2] ss:$0 sm:$0xff]  ;;  %v22_v3 = vsub.f32 %v14_v0, %v43_v1 }
   0x5   :  { %v30_v4 = vmul.f32 %v44_v2, %v22_v3 }
   0x7   :  { %v31_v5 = vand.u32 2147483647, %v30_v4 }
   0x9   :  { %v45_v6 = vmul.f32 -1.442695, %v31_v5 }
   0xb   :  { %46 = vpow2.f32 %v45_v6 }
  0x15   :  { %v47_v7 = vpop.eup %46 }
  0x16   :  { %v35_v8 = vadd.f32 1.0, %v47_v7 }
  0x18   :  { %48 = vrcp.f32 %v35_v8 }
  0x22   :  { %v49_v9 = vpop.eup %48 }
  0x23   :  { %38 = vst [vmem:[%s85_s3] sm:$0xf] %v49_v9 }

// kernel: gdn_forward.3
= control target key start
LH: loop header
LB: loop body
LE: loop exit
PB: predicated region body
PF: predicated region fallthrough
CT: control target
= control target key end

     0   :  { %vm68_vm0 = vcmask 261120   ;;  %v3199_v39 = vmov 0   ;;  %v3201_v40 = vmov 0.0   ;;  %vm2396_vm1 = vmmov 0   ;;  %s3189_s1 = inlined_call_operand.vmem [shape: bf16[32,128], index: 1, kind: input, shape index: {}]   ;;  %s3190_s0 = inlined_call_operand.vmem [shape: f32[8,8,32], index: 0, kind: input, shape index: {}]   ;;  %s3191_s3 = inlined_call_operand.vmem [shape: bf16[128,384], index: 3, kind: input, shape index: {}]   ;;  %s3192_s5 = inlined_call_operand.vmem [shape: bf16[128,384], index: 5, kind: input, shape index: {}]   ;;  %s3193_s2 = inlined_call_operand.vmem [shape: f32[1,128], index: 2, kind: input, shape index: {}]   ;;  %s3194_s4 = inlined_call_operand.vmem [shape: f32[1,384], index: 4, kind: input, shape index: {}]   ;;  %s3195_s6 = inlined_call_operand.vmem [shape: f32[1,128], index: 6, kind: input, shape index: {}]   ;;  %s3196_s7 = inlined_call_operand.vmem [shape: bf16[128,128], index: 7, kind: input, shape index: {}]   ;;  %s3197_s8 = inlined_call_operand.vmem [shape: f32[1,128], index: 8, kind: input, shape index: {}]   ;;  %s3198_s9 = inlined_call_operand.vmem [shape: f32[8,8,128], index: 9, kind: output, shape index: {}]  }
   0x1   :  { %v2187_v0 = vld [vmem:[%s3189_s1] sm:$0xff]   ;;  %v2188_v1 = vld [vmem:[%s3189_s1 + $0x8] sm:$0xff]   ;;  %v35_v5 = vld [vmem:[%s3190_s0 + $0x10] sm:$0xff]  ;;  %367 = vmatprep.mubr.bf16.mxu1 %v3199_v39 }
   0x2   :  { %1964 = vmatprep.subr.bf16.mxu0 %v2187_v0  ;;  %v33_v2 = vld [vmem:[%s3190_s0] sm:$0xff]  ;;  %v34_v3 = vld [vmem:[%s3190_s0 + $0x8] sm:$0xff]  ;;  %v36_v6 = vld [vmem:[%s3190_s0 + $0x18] sm:$0xff] }
   0x3   :  { %1965 = vmatpush3.bf16.msra.mxu0 %v2187_v0  ;;  %v41_v4 = vpack.c.bf16 %v34_v3, %v33_v2  ;;  %v37_v7 = vld [vmem:[%s3190_s0 + $0x20] sm:$0xff]  ;;  %v38_v8 = vld [vmem:[%s3190_s0 + $0x28] sm:$0xff]  ;;  %v42_v11 = vpack.c.bf16 %v36_v6, %v35_v5  ;;  %v39_v17 = vld [vmem:[%s3190_s0 + $0x30] sm:$0xff] }
   0x4   :  { %1966 = vmatprep.subr.bf16.mxu0 %v2188_v1  ;;  %v2189_v9 = vld [vmem:[%s3191_s3 + $0x4] ss:$12 sps:$4 sm:$0xff]   ;;  %v2191_v10 = vld [vmem:[%s3191_s3] ss:$12 sps:$4 sm:$0xff]   ;;  %v2192_v12 = vld [vmem:[%s3191_s3 + $0x8] ss:$12 sps:$4 sm:$0xff]   ;;  %v43_v13 = vpack.c.bf16 %v38_v8, %v37_v7 }
   0x5   :  { %1968 = vmatprep.mubr.msk.bf16.mxu0 %vm68_vm0, %v41_v4  ;;  %335 = vmatprep.subr.bf16.mxu1 %v2189_v9  ;;  %v2193_v14 = vld [vmem:[%s3191_s3 + $0x1c] ss:$12 sps:$4 sm:$0xff]   ;;  %v2195_v15 = vld [vmem:[%s3191_s3 + $0x18] ss:$12 sps:$4 sm:$0xff]   ;;  %v2196_v16 = vld [vmem:[%s3191_s3 + $0x20] ss:$12 sps:$4 sm:$0xff]  }
   0x6   :  { %336 = vmatpush1.bf16.msra.mxu1 %v2191_v10  ;;  %v2197_v18 = vld [vmem:[%s3191_s3 + $0x34] ss:$12 sps:$4 sm:$0xff]   ;;  %v40_v19 = vld [vmem:[%s3190_s0 + $0x38] sm:$0xff]  ;;  %v2205_v26 = vld [vmem:[%s3191_s3 + $0x64] ss:$12 sps:$4 sm:$0xff]  }
   0x7   :  { %1967 = vmatpush3.bf16.msra.mxu0 %v2188_v1  ;;  %337 = vmatprep.subr.bf16.mxu1 %v2193_v14  ;;  %v2199_v20 = vld [vmem:[%s3191_s3 + $0x30] ss:$12 sps:$4 sm:$0xff]   ;;  %v2200_v21 = vld [vmem:[%s3191_s3 + $0x38] ss:$12 sps:$4 sm:$0xff]   ;;  %v44_v23 = vpack.c.bf16 %v40_v19, %v39_v17  ;;  %v2203_v24 = vld [vmem:[%s3191_s3 + $0x48] ss:$12 sps:$4 sm:$0xff]  }
   0x8   :  { %1976 = vmatprep.subr.bf16.mxu0 %v2192_v12  ;;  %v2201_v22 = vld [vmem:[%s3191_s3 + $0x4c] ss:$12 sps:$4 sm:$0xff]   ;;  %v2204_v25 = vld [vmem:[%s3191_s3 + $0x50] ss:$12 sps:$4 sm:$0xff]   ;;  %v2208_v28 = vld [vmem:[%s3191_s3 + $0x68] ss:$12 sps:$4 sm:$0xff]  }
   0x9   :  { %v2207_v27 = vld [vmem:[%s3191_s3 + $0x60] ss:$12 sps:$4 sm:$0xff]   ;;  %v2209_v29 = vld [vmem:[%s3191_s3 + $0x7c] ss:$12 sps:$4 sm:$0xff]   ;;  %v2211_v30 = vld [vmem:[%s3191_s3 + $0x78] ss:$12 sps:$4 sm:$0xff]  }
   0xa   :  { %1969 = vmatmul.mubr.msk.bf16.vlgmr.msra.gmra.mrb[0].mxu0 %vm68_vm0, %v42_v11  ;;  %338 = vmatpush1.bf16.msra.mxu1 %v2195_v15  ;;  %v2212_v31 = vld [vmem:[%s3191_s3 + $0x80] ss:$12 sps:$4 sm:$0xff]   ;;  %v2215_v33 = vld [vmem:[%s3191_s3 + $0x90] ss:$12 sps:$4 sm:$0xff]   ;;  %v2216_v34 = vld [vmem:[%s3191_s3 + $0x98] ss:$12 sps:$4 sm:$0xff]  }
   0xb   :  { %1972 = vmatprep.mubr.msk.bf16.mxu0 %vm68_vm0, %v43_v13  ;;  %1977 = vmatpush3.bf16.msra.mxu0 %v2192_v12  ;;  %v2213_v32 = vld [vmem:[%s3191_s3 + $0x94] ss:$12 sps:$4 sm:$0xff]   ;;  %v2217_v35 = vld [vmem:[%s3191_s3 + $0xac] ss:$12 sps:$4 sm:$0xff]   ;;  %v2220_v37 = vld [vmem:[%s3191_s3 + $0xb0] ss:$12 sps:$4 sm:$0xff]  }
   0xc   :  { %1978 = vmatprep.subr.bf16.mxu0 %v2196_v16  ;;  %339 = vmatprep.subr.bf16.mxu1 %v2197_v18  ;;  %v2219_v36 = vld [vmem:[%s3191_s3 + $0xa8] ss:$12 sps:$4 sm:$0xff]   ;;  %v2556_v38 = vld [vmem:[%s3192_s5 + $0x4] ss:$12 sps:$4 sm:$0xff]   ;;  %v1773_v41 = vld [vmem:[%s3193_s2] ss:$0 sm:$0xff] }
   0xd   :  { %v2567_v55 = vld [vmem:[%s3192_s5] ss:$12 sps:$4 sm:$0xff]   ;;  %v2572_v58 = vld [vmem:[%s3192_s5 + $0x1c] ss:$12 sps:$4 sm:$0xff]   ;;  %v2583_v3 = vld [vmem:[%s3192_s5 + $0x18] ss:$12 sps:$4 sm:$0xff]  }
   0xe   :  { %340 = vmatpush1.bf16.msra.mxu1 %v2199_v20  ;;  %v2577_v61 = vld [vmem:[%s3192_s5 + $0x8] ss:$12 sps:$4 sm:$0xff]   ;;  %v2596_v8 = vld [vmem:[%s3192_s5 + $0x20] ss:$12 sps:$4 sm:$0xff]   ;;  %v2603_v11 = vld [vmem:[%s3192_s5 + $0x30] ss:$12 sps:$4 sm:$0xff]  }
   0xf   :  { %1979 = vmatpush3.bf16.msra.mxu0 %v2196_v16  ;;  %341 = vmatprep.subr.bf16.mxu1 %v2201_v22  ;;  %v2590_v6 = vld [vmem:[%s3192_s5 + $0x34] ss:$12 sps:$4 sm:$0xff]   ;;  %v2609_v13 = vld [vmem:[%s3192_s5 + $0x4c] ss:$12 sps:$4 sm:$0xff]   ;;  %v2628_v16 = vld [vmem:[%s3192_s5 + $0x64] ss:$12 sps:$4 sm:$0xff]  }
  0x10   :  { %1980 = vmatprep.subr.bf16.mxu0 %v2200_v21  ;;  %v2615_v14 = vld [vmem:[%s3192_s5 + $0x38] ss:$12 sps:$4 sm:$0xff]   ;;  %v2621_v15 = vld [vmem:[%s3192_s5 + $0x48] ss:$12 sps:$4 sm:$0xff]   ;;  %v2637_v17 = vld [vmem:[%s3192_s5 + $0x50] ss:$12 sps:$4 sm:$0xff]  }
  0x11   :  { %v2643_v18 = vld [vmem:[%s3192_s5 + $0x60] ss:$12 sps:$4 sm:$0xff]   ;;  %v2650_v19 = vld [vmem:[%s3192_s5 + $0x7c] ss:$12 sps:$4 sm:$0xff]  }
  0x12   :  { %1973 = vmatmul.mubr.msk.bf16.gmra.mrb[4].mxu0 %vm68_vm0, %v44_v23  ;;  %342 = vmatpush1.bf16.msra.mxu1 %v2203_v24  ;;  %v2656_v20 = vld [vmem:[%s3192_s5 + $0x68] ss:$12 sps:$4 sm:$0xff]   ;;  %v2676_v23 = vld [vmem:[%s3192_s5 + $0x80] ss:$12 sps:$4 sm:$0xff]   ;;  %v2682_v24 = vld [vmem:[%s3192_s5 + $0x90] ss:$12 sps:$4 sm:$0xff]  }
  0x13   :  { %1981 = vmatpush3.bf16.msra.mxu0 %v2200_v21  ;;  %343 = vmatprep.subr.bf16.mxu1 %v2205_v26  ;;  %v2662_v21 = vld [vmem:[%s3192_s5 + $0x78] ss:$12 sps:$4 sm:$0xff]   ;;  %v2669_v22 = vld [vmem:[%s3192_s5 + $0x94] ss:$12 sps:$4 sm:$0xff]  }
  0x14   :  { %1982 = vmatprep.subr.bf16.mxu0 %v2204_v25  ;;  %v2695_v26 = vld [vmem:[%s3192_s5 + $0x98] ss:$12 sps:$4 sm:$0xff]  }
  0x16   :  { %344 = vmatpush1.bf16.msra.mxu1 %v2207_v27  ;;  %v2701_v27 = vld [vmem:[%s3192_s5 + $0xa8] ss:$12 sps:$4 sm:$0xff]  }
  0x17   :  { %1983 = vmatpush3.bf16.msra.mxu0 %v2204_v25  ;;  %345 = vmatprep.subr.bf16.mxu1 %v2209_v29  ;;  %v2689_v25 = vld [vmem:[%s3192_s5 + $0xac] ss:$12 sps:$4 sm:$0xff]   ;;  %v192_v29 = vlaneseq }
  0x18   :  { %1984 = vmatprep.subr.bf16.mxu0 %v2208_v28 }
  0x1a   :  { %346 = vmatpush1.bf16.msra.mxu1 %v2211_v30  ;;  %v193_v30 = vshrl.u32 %v192_v29, 7 }
  0x1b   :  { %1985 = vmatpush3.bf16.msra.mxu0 %v2208_v28  ;;  %347 = vmatprep.subr.bf16.mxu1 %v2213_v32  ;;  %v2710_v28 = vld [vmem:[%s3192_s5 + $0xb0] ss:$12 sps:$4 sm:$0xff]   ;;  %v190_v32 = vld [vmem:[%s3194_s4] sm:$0x7] }
  0x1c   :  { %1986 = vmatprep.subr.bf16.mxu0 %v2212_v31 }
  0x1e   :  { %348 = vmatpush1.bf16.msra.mxu1 %v2215_v33  ;;  %v194_v33 = vsub.s32 0, %v193_v30 }
  0x1f   :  { %1987 = vmatpush3.bf16.msra.mxu0 %v2212_v31  ;;  %349 = vmatprep.subr.bf16.mxu1 %v2217_v35  ;;  %v202_v31 = vsub.s32 2, %v193_v30 }
  0x20   :  { %1988 = vmatprep.subr.bf16.mxu0 %v2216_v34 }
  0x21   :  { %v2757_v35 = vrot.slane %v190_v32, %v202_v31 }
  0x22   :  { %350 = vmatpush1.bf16.msra.mxu1 %v2219_v36 }
  0x23   :  { %1989 = vmatpush3.bf16.msra.mxu0 %v2216_v34  ;;  %670 = vmatprep.subr.bf16.mxu1 %v2556_v38  ;;  %v198_v34 = vsub.s32 1, %v193_v30 }
  0x24   :  { %1990 = vmatprep.subr.bf16.mxu0 %v2220_v37 }
  0x27   :  { %1991 = vmatpush3.bf16.msra.mxu0 %v2220_v37  ;;  %v195_v37 = vrot.slane %v190_v32, %v194_v33 }
  0x28   :  { %2000 = vmatprep.subr.bf16.mxu0 %v3201_v40 }
  0xdd   :  { %v1970_v42 = vpop.f32.mrb[0].mxu0 }
  0xde   :  { %v124_v43 = vadd.f32 %v1970_v42, %v1773_v41  ;;  %v115_v44 = vpop.f32.mrb[1].mxu0 }
  0xdf   :  { %v116_v45 = vadd.f32 %v1773_v41, %v115_v44  ;;  %v1971_v46 = vpop.f32.mrb[2].mxu0 }
  0xe0   :  { %v127_v47 = vadd.f32 %v1971_v46, %v1773_v41  ;;  %v118_v48 = vpop.f32.mrb[3].mxu0  ;;  %v148_v50 = vmax.f32 %v124_v43, 0.0  ;;  %v199_v43 = vrot.slane %v190_v32, %v198_v34 }
  0xe1   :  { %v119_v49 = vadd.f32 %v1773_v41, %v118_v48  ;;  %v146_v52 = vmax.f32 %v116_v45, 0.0 }
  0xe2   :  { %v149_v51 = vmax.f32 %v127_v47, 0.0 }
  0xe3   :  { %v147_v53 = vmax.f32 %v119_v49, 0.0 }
  0xe4   :  { %v155_v54 = vpack.c.bf16 %v149_v51, %v148_v50 }
  0xe5   :  { %v154_v56 = vpack.c.bf16 %v147_v53, %v146_v52  ;;  %v1974_v57 = vpop.f32.mrb[4].mxu0 }
  0xe6   :  { %v140_v59 = vadd.f32 %v1974_v57, %v1773_v41  ;;  %v131_v60 = vpop.f32.mrb[5].mxu0 }
  0xe7   :  { %v132_v62 = vadd.f32 %v1773_v41, %v131_v60  ;;  %368 = vmatmul.mubr.bf16.vlgmr.msra.gmra.mrb[0].mxu1 %v154_v56  ;;  %1992 = vmatprep.mubr.bf16.mxu0 %v154_v56  ;;  %v1975_v63 = vpop.f32.mrb[6].mxu0 }
  0xe8   :  { %v152_v0 = vmax.f32 %v140_v59, 0.0  ;;  %671 = vmatpush1.bf16.msra.mxu1 %v2567_v55  ;;  %v143_v1 = vadd.f32 %v1975_v63, %v1773_v41  ;;  %1993 = vmatmul.mubr.bf16.vlgmr.msra.gmra.mrb[8].mxu0 %v155_v54  ;;  %v134_v2 = vpop.f32.mrb[7].mxu0 }
  0xe9   :  { %v150_v4 = vmax.f32 %v132_v62, 0.0  ;;  %v135_v5 = vadd.f32 %v1773_v41, %v134_v2  ;;  %672 = vmatprep.subr.bf16.mxu1 %v2572_v58  ;;  %377 = vmatprep.mubr.bf16.mxu1 %v3199_v39 }
  0xea   :  { %v153_v7 = vmax.f32 %v143_v1, 0.0  ;;  %2001 = vmatpush3.bf16.msra.mxu0 %v2577_v61 }
  0xeb   :  { %v151_v9 = vmax.f32 %v135_v5, 0.0  ;;  %2002 = vmatprep.subr.bf16.mxu0 %v3201_v40 }
  0xec   :  { %v157_v10 = vpack.c.bf16 %v153_v7, %v152_v0  ;;  %673 = vmatpush1.bf16.msra.mxu1 %v2583_v3 }
  0xed   :  { %v156_v12 = vpack.c.bf16 %v151_v9, %v150_v4  ;;  %674 = vmatprep.subr.bf16.mxu1 %v2590_v6 }
  0xee   :  { %2003 = vmatpush3.bf16.msra.mxu0 %v2596_v8 }
  0xef   :  { %378 = vmatmul.mubr.bf16.gmra.mrb[4].mxu1 %v155_v54  ;;  %1996 = vmatprep.mubr.bf16.mxu0 %v156_v12 }
  0xf0   :  { %675 = vmatpush1.bf16.msra.mxu1 %v2603_v11  ;;  %1997 = vmatmul.mubr.bf16.gmra.mrb[12].mxu0 %v157_v10 }
  0xf1   :  { %676 = vmatprep.subr.bf16.mxu1 %v2609_v13  ;;  %387 = vmatprep.mubr.bf16.mxu1 %v3199_v39 }
  0xf2   :  { %2004 = vmatprep.subr.bf16.mxu0 %v3201_v40  ;;  %2016 = vmatprep.mubr.msk.bf16.mxu0 %vm2396_vm1, %v3201_v40 }
  0xf3   :  { %2005 = vmatpush3.bf16.msra.mxu0 %v2615_v14 }
  0xf4   :  { %677 = vmatpush1.bf16.msra.mxu1 %v2621_v15  ;;  %2006 = vmatprep.subr.bf16.mxu0 %v3201_v40 }
  0xf5   :  { %678 = vmatprep.subr.bf16.mxu1 %v2628_v16 }
  0xf7   :  { %388 = vmatmul.mubr.bf16.gmra.mrb[8].mxu1 %v156_v12  ;;  %2007 = vmatpush3.bf16.msra.mxu0 %v2637_v17 }
  0xf8   :  { %679 = vmatpush1.bf16.msra.mxu1 %v2643_v18  ;;  %397 = vmatprep.mubr.bf16.mxu1 %v3199_v39 }
  0xf9   :  { %680 = vmatprep.subr.bf16.mxu1 %v2650_v19  ;;  %2008 = vmatprep.subr.bf16.mxu0 %v3201_v40 }
  0xfb   :  { %2009 = vmatpush3.bf16.msra.mxu0 %v2656_v20 }
  0xfc   :  { %681 = vmatpush1.bf16.msra.mxu1 %v2662_v21  ;;  %2010 = vmatprep.subr.bf16.mxu0 %v3201_v40 }
  0xfd   :  { %682 = vmatprep.subr.bf16.mxu1 %v2669_v22 }
  0xff   :  { %398 = vmatmul.mubr.bf16.gmra.mrb[12].mxu1 %v157_v10  ;;  %2011 = vmatpush3.bf16.msra.mxu0 %v2676_v23 }
 0x100   :  { %683 = vmatpush1.bf16.msra.mxu1 %v2682_v24  ;;  %702 = vmatprep.mubr.bf16.mxu1 %v3199_v39 }
 0x101   :  { %684 = vmatprep.subr.bf16.mxu1 %v2689_v25  ;;  %2012 = vmatprep.subr.bf16.mxu0 %v3201_v40 }
 0x103   :  { %2013 = vmatpush3.bf16.msra.mxu0 %v2695_v26 }
 0x104   :  { %685 = vmatpush1.bf16.msra.mxu1 %v2701_v27  ;;  %2014 = vmatprep.subr.bf16.mxu0 %v3201_v40 }
 0x105   :  { %781 = vmatprep.subr.bf16.mxu1 %v2556_v38 }
 0x107   :  { %703 = vmatmul.mubr.bf16.vlgmr.msra.gmra.mrb[16].mxu1 %v3199_v39  ;;  %2015 = vmatpush3.bf16.msra.mxu0 %v2710_v28 }
 0x108   :  { %2020 = vmatprep.subr.bf16.mxu0 %v3201_v40  ;;  %782 = vmatpush1.bf16.msra.mxu1 %v2567_v55 }
 0x109   :  { %783 = vmatprep.subr.bf16.mxu1 %v2572_v58  ;;  %813 = vmatprep.mubr.bf16.mxu1 %v3199_v39 }
 0x10a   :  { %2017 = vmatmul.mubr.bf16.vlgmr.msra.gmra.mrb[16].mxu0 %v3199_v39 }
 0x10b   :  { %2021 = vmatpush3.bf16.msra.mxu0 %v2577_v61  ;;  %2036 = vmatprep.mubr.msk.bf16.mxu0 %vm2396_vm1, %v3201_v40 }
 0x10c   :  { %2022 = vmatprep.subr.bf16.mxu0 %v3201_v40  ;;  %784 = vmatpush1.bf16.msra.mxu1 %v2583_v3 }
 0x10d   :  { %785 = vmatprep.subr.bf16.mxu1 %v2590_v6 }
 0x10f   :  { %2023 = vmatpush3.bf16.msra.mxu0 %v2596_v8 }
 0x110   :  { %2024 = vmatprep.subr.bf16.mxu0 %v3201_v40  ;;  %786 = vmatpush1.bf16.msra.mxu1 %v2603_v11 }
 0x111   :  { %787 = vmatprep.subr.bf16.mxu1 %v2609_v13 }
 0x113   :  { %2025 = vmatpush3.bf16.msra.mxu0 %v2615_v14 }
 0x114   :  { %2026 = vmatprep.subr.bf16.mxu0 %v3201_v40  ;;  %788 = vmatpush1.bf16.msra.mxu1 %v2621_v15 }
 0x115   :  { %789 = vmatprep.subr.bf16.mxu1 %v2628_v16 }
 0x117   :  { %2027 = vmatpush3.bf16.msra.mxu0 %v2637_v17 }
 0x118   :  { %2028 = vmatprep.subr.bf16.mxu0 %v3201_v40  ;;  %790 = vmatpush1.bf16.msra.mxu1 %v2643_v18 }
 0x119   :  { %791 = vmatprep.subr.bf16.mxu1 %v2650_v19 }
 0x11b   :  { %2029 = vmatpush3.bf16.msra.mxu0 %v2656_v20 }
 0x11c   :  { %2030 = vmatprep.subr.bf16.mxu0 %v3201_v40  ;;  %792 = vmatpush1.bf16.msra.mxu1 %v2662_v21 }
 0x11d   :  { %793 = vmatprep.subr.bf16.mxu1 %v2669_v22 }
 0x11f   :  { %2031 = vmatpush3.bf16.msra.mxu0 %v2676_v23 }
 0x120   :  { %2032 = vmatprep.subr.bf16.mxu0 %v3201_v40  ;;  %794 = vmatpush1.bf16.msra.mxu1 %v2682_v24 }
 0x121   :  { %795 = vmatprep.subr.bf16.mxu1 %v2689_v25 }
 0x123   :  { %2033 = vmatpush3.bf16.msra.mxu0 %v2695_v26 }
 0x124   :  { %2034 = vmatprep.subr.bf16.mxu0 %v3201_v40  ;;  %796 = vmatpush1.bf16.msra.mxu1 %v2701_v27 }
 0x125   :  { %893 = vmatprep.subr.bf16.mxu1 %v2556_v38 }
 0x127   :  { %2035 = vmatpush3.bf16.msra.mxu0 %v2710_v28 }
 0x128   :  { %2040 = vmatprep.subr.bf16.mxu0 %v3201_v40 }
 0x1ba   :  { %v369_v36 = vpop.f32.mrb[0].mxu1 }
 0x1bb   :  { %v371_v41 = vpop.f32.mrb[1].mxu1  ;;  %v1994_v42 = vpop.f32.mrb[8].mxu0 }
 0x1bc   :  { %v2760_v44 = vadd.f32 %v1994_v42, %v2757_v35  ;;  %v373_v45 = vpop.f32.mrb[2].mxu1  ;;  %v2762_v46 = vpop.f32.mrb[9].mxu0 }
 0x1bd   :  { %v2764_v47 = vadd.f32 %v373_v45, %v195_v37  ;;  %v375_v48 = vpop.f32.mrb[3].mxu1  ;;  %v1995_v49 = vpop.f32.mrb[10].mxu0 }
 0x1be   :  { %v2766_v50 = vadd.f32 %v375_v48, %v199_v43  ;;  %v2769_v51 = vadd.f32 %v1995_v49, %v2757_v35  ;;  %v445_v52 = vpop.f32.mrb[11].mxu0 }
 0x1bf   :  { %v2772_v53 = vadd.f32 %v445_v52, %v2757_v35 }
 0x1c2   :  { %v379_v54 = vpop.f32.mrb[4].mxu1 }
 0x1c3   :  { %v2774_v56 = vadd.f32 %v379_v54, %v195_v37  ;;  %v381_v57 = vpop.f32.mrb[5].mxu1  ;;  %v1998_v59 = vpop.f32.mrb[12].mxu0 }
 0x1c4   :  { %v2776_v60 = vadd.f32 %v381_v57, %v199_v43  ;;  %v383_v62 = vpop.f32.mrb[6].mxu1  ;;  %v2779_v63 = vadd.f32 %v1998_v59, %v2757_v35  ;;  %v458_v0 = vpop.f32.mrb[13].mxu0 }
 0x1c5   :  { %v2781_v1 = vadd.f32 %v383_v62, %v195_v37  ;;  %v385_v2 = vpop.f32.mrb[7].mxu1  ;;  %v2784_v4 = vadd.f32 %v458_v0, %v2757_v35  ;;  %v1999_v5 = vpop.f32.mrb[14].mxu0 }
 0x1c6   :  { %3203 = vst [vmem:[#allocation4_spill] sm:$0xff] %v2779_v63  ;;  %v2786_v7 = vadd.f32 %v385_v2, %v199_v43  ;;  %v2789_v9 = vadd.f32 %v1999_v5, %v2757_v35  ;;  %v461_v10 = vpop.f32.mrb[15].mxu0  ;;  %v370_v2 = vadd.f32 %v369_v36, %v195_v37  ;;  %v372_v5 = vadd.f32 %v371_v41, %v199_v43  ;;  %v2813_v36 = vld [vmem:[%s3195_s6] ss:$0 sm:$0xff] }
 0x1c7   :  { %v2792_v12 = vadd.f32 %v461_v10, %v2757_v35 }
 0x1c8   :  { %3204 = vst [vmem:[#allocation5_spill] sm:$0xff] %v2789_v9 }
 0x1ca   :  { %v389_v29 = vpop.f32.mrb[8].mxu1 }
 0x1cb   :  { %v2794_v30 = vadd.f32 %v389_v29, %v195_v37  ;;  %v391_v31 = vpop.f32.mrb[9].mxu1 }
 0x1cc   :  { %v2796_v32 = vadd.f32 %v391_v31, %v199_v43  ;;  %v393_v33 = vpop.f32.mrb[10].mxu1 }
 0x1cd   :  { %v2798_v34 = vadd.f32 %v393_v33, %v195_v37  ;;  %v395_v42 = vpop.f32.mrb[11].mxu1 }
 0x1ce   :  { %v2800_v45 = vadd.f32 %v395_v42, %v199_v43 }
 0x1d2   :  { %v399_v48 = vpop.f32.mrb[12].mxu1 }
 0x1d3   :  { %v2802_v49 = vadd.f32 %v399_v48, %v195_v37  ;;  %v401_v52 = vpop.f32.mrb[13].mxu1 }
 0x1d4   :  { %v2804_v54 = vadd.f32 %v401_v52, %v199_v43  ;;  %v403_v57 = vpop.f32.mrb[14].mxu1 }
 0x1d5   :  { %v2806_v59 = vadd.f32 %v403_v57, %v195_v37  ;;  %v405_v62 = vpop.f32.mrb[15].mxu1 }
 0x1d6   :  { %3205 = vst [vmem:[#allocation6_spill] sm:$0xff] %v2804_v54  ;;  %v2808_v0 = vadd.f32 %v405_v62, %v199_v43 }
 0x1d7   :  { %3206 = vst [vmem:[#allocation7_spill] sm:$0xff] %v2806_v59 }
 0x1da   :  { %v704_v10 = vpop.f32.mrb[16].mxu1 }
 0x1db   :  { %v751_v29 = vadd.f32 %v704_v10, %v370_v2  ;;  %v706_v31 = vpop.f32.mrb[17].mxu1 }
 0x1dc   :  { %v758_v33 = vadd.f32 %v706_v31, %v372_v5  ;;  %v708_v42 = vpop.f32.mrb[18].mxu1 }
 0x1dd   :  { %v1829_v39 = vmul.f32 -1.442695, %v751_v29  ;;  %v709_v40 = vpop.f32.mrb[19].mxu1  ;;  %v745_v48 = vpop.f32.mrb[16].mxu0 }
 0x1de   :  { %v2018_v9 = vpop.f32.mrb[17].mxu0  ;;  %v1830_v54 = vmul.f32 -1.442695, %v758_v33  ;;  %v765_v41 = vadd.f32 %v2813_v36, %v745_v48 }
 0x1df   :  { %2261 = vpow2.f32 %v1829_v39  ;;  %v748_v52 = vpop.f32.mrb[18].mxu0  ;;  %v443_v39 = vadd.f32 %v2762_v46, %v2757_v35  ;;  %v3207_v35 = vmov 0.0   ;;  %v3208_v46 = vmov 0  }
 0x1e0   :  { %v2019_v63 = vpop.f32.mrb[19].mxu0  ;;  %2263 = vpow2.f32 %v1830_v54 }
 0x1e9   :  { %v2262_v57 = vpop.eup %2261 }
 0x1ea   :  { %v755_v59 = vadd.f32 1.0, %v2262_v57  ;;  %v2264_v62 = vpop.eup %2263 }
 0x1eb   :  { %v762_v37 = vadd.f32 1.0, %v2264_v62 }
 0x1ec   :  { %2265 = vrcp.f32 %v755_v59 }
 0x1ed   :  { %2267 = vrcp.f32 %v762_v37 }
 0x1f6   :  { %v2266_v40 = vpop.eup %2265 }
 0x1f7   :  { %v766_v43 = vmul.f32 %v2266_v40, %v765_v41  ;;  %v2268_v9 = vpop.eup %2267 }
 0x1f8   :  { %v769_v54 = vsub.f32 1.0, %v2268_v9  ;;  %v771_v5 = vmul.f32 0.0, %v2268_v9 }
 0x1f9   :  { %v767_v63 = vadd.f32 %v766_v43, %v443_v39 }
 0x1fb   :  { %2269 = vtanh.f32 %v767_v63 }
 0x205   :  { %v2270_v59 = vpop.eup %2269 }
 0x206   :  { %v770_v2 = vmul.f32 %v2270_v59, %v769_v54 }
 0x208   :  { %v2818_v10 = vadd.f32 %v771_v5, %v770_v2 }
 0x20a   :  { %v780_v29 = vpack.c.bf16 %v2818_v10, %v2818_v10 }
 0x20c   :  { %814 = vmatmul.mubr.bf16.vlgmr.msra.gmra.mrb[20].mxu1 %v780_v29  ;;  %2037 = vmatmul.mubr.bf16.vlgmr.msra.gmra.mrb[20].mxu0 %v780_v29 }
 0x20d   :  { %894 = vmatpush1.bf16.msra.mxu1 %v2567_v55  ;;  %2041 = vmatpush3.bf16.msra.mxu0 %v2577_v61 }
 0x20e   :  { %895 = vmatprep.subr.bf16.mxu1 %v2572_v58  ;;  %2042 = vmatprep.subr.bf16.mxu0 %v3207_v35 }
 0x20f   :  { %925 = vmatprep.mubr.bf16.mxu1 %v3208_v46  ;;  %2056 = vmatprep.mubr.msk.bf16.mxu0 %vm2396_vm1, %v3207_v35 }
 0x211   :  { %896 = vmatpush1.bf16.msra.mxu1 %v2583_v3  ;;  %2043 = vmatpush3.bf16.msra.mxu0 %v2596_v8 }
 0x212   :  { %897 = vmatprep.subr.bf16.mxu1 %v2590_v6  ;;  %2044 = vmatprep.subr.bf16.mxu0 %v3207_v35 }
 0x215   :  { %898 = vmatpush1.bf16.msra.mxu1 %v2603_v11  ;;  %2045 = vmatpush3.bf16.msra.mxu0 %v2615_v14 }
 0x216   :  { %899 = vmatprep.subr.bf16.mxu1 %v2609_v13  ;;  %2046 = vmatprep.subr.bf16.mxu0 %v3207_v35 }
 0x219   :  { %900 = vmatpush1.bf16.msra.mxu1 %v2621_v15  ;;  %2047 = vmatpush3.bf16.msra.mxu0 %v2637_v17 }
 0x21a   :  { %901 = vmatprep.subr.bf16.mxu1 %v2628_v16  ;;  %2048 = vmatprep.subr.bf16.mxu0 %v3207_v35 }
 0x21d   :  { %902 = vmatpush1.bf16.msra.mxu1 %v2643_v18  ;;  %2049 = vmatpush3.bf16.msra.mxu0 %v2656_v20 }
 0x21e   :  { %903 = vmatprep.subr.bf16.mxu1 %v2650_v19  ;;  %2050 = vmatprep.subr.bf16.mxu0 %v3207_v35 }
 0x221   :  { %904 = vmatpush1.bf16.msra.mxu1 %v2662_v21  ;;  %2051 = vmatpush3.bf16.msra.mxu0 %v2676_v23 }
 0x222   :  { %905 = vmatprep.subr.bf16.mxu1 %v2669_v22  ;;  %2052 = vmatprep.subr.bf16.mxu0 %v3207_v35 }
 0x225   :  { %906 = vmatpush1.bf16.msra.mxu1 %v2682_v24  ;;  %2053 = vmatpush3.bf16.msra.mxu0 %v2695_v26 }
 0x226   :  { %907 = vmatprep.subr.bf16.mxu1 %v2689_v25  ;;  %2054 = vmatprep.subr.bf16.mxu0 %v3207_v35 }
 0x229   :  { %908 = vmatpush1.bf16.msra.mxu1 %v2701_v27  ;;  %2055 = vmatpush3.bf16.msra.mxu0 %v2710_v28 }
 0x22a   :  { %1005 = vmatprep.subr.bf16.mxu1 %v2556_v38  ;;  %2060 = vmatprep.subr.bf16.mxu0 %v3207_v35 }
 0x2df   :  { %v815_v31 = vpop.f32.mrb[20].mxu1  ;;  %v856_v33 = vpop.f32.mrb[20].mxu0 }
 0x2e0   :  { %v862_v42 = vadd.f32 %v815_v31, %v2764_v47  ;;  %v817_v48 = vpop.f32.mrb[21].mxu1  ;;  %v2038_v52 = vpop.f32.mrb[21].mxu0  ;;  %v876_v2 = vadd.f32 %v2813_v36, %v856_v33 }
 0x2e1   :  { %v869_v57 = vadd.f32 %v817_v48, %v2766_v50  ;;  %v819_v62 = vpop.f32.mrb[22].mxu1  ;;  %v859_v37 = vpop.f32.mrb[22].mxu0 }
 0x2e2   :  { %v1831_v41 = vmul.f32 -1.442695, %v862_v42  ;;  %v820_v40 = vpop.f32.mrb[23].mxu1  ;;  %v2039_v39 = vpop.f32.mrb[23].mxu0 }
 0x2e3   :  { %v1832_v43 = vmul.f32 -1.442695, %v869_v57 }
 0x2e4   :  { %2271 = vpow2.f32 %v1831_v41 }
 0x2e5   :  { %2273 = vpow2.f32 %v1832_v43 }
 0x2ee   :  { %v2272_v63 = vpop.eup %2271 }
 0x2ef   :  { %v866_v9 = vadd.f32 1.0, %v2272_v63  ;;  %v2274_v54 = vpop.eup %2273 }
 0x2f0   :  { %v873_v59 = vadd.f32 1.0, %v2274_v54 }
 0x2f1   :  { %2275 = vrcp.f32 %v866_v9 }
 0x2f2   :  { %2277 = vrcp.f32 %v873_v59 }
 0x2fb   :  { %v2276_v47 = vpop.eup %2275 }
 0x2fc   :  { %v877_v5 = vmul.f32 %v2276_v47, %v876_v2  ;;  %v2278_v29 = vpop.eup %2277 }
 0x2fd   :  { %v880_v31 = vsub.f32 1.0, %v2278_v29  ;;  %v882_v52 = vmul.f32 %v2278_v29, %v2818_v10 }
 0x2fe   :  { %v878_v50 = vadd.f32 %v877_v5, %v2772_v53 }
 0x300   :  { %2279 = vtanh.f32 %v878_v50 }
 0x30a   :  { %v2280_v42 = vpop.eup %2279 }
 0x30b   :  { %v881_v48 = vmul.f32 %v2280_v42, %v880_v31 }
 0x30d   :  { %v2862_v57 = vadd.f32 %v882_v52, %v881_v48 }
 0x30f   :  { %v892_v62 = vpack.c.bf16 %v2862_v57, %v2862_v57 }
 0x311   :  { %926 = vmatmul.mubr.bf16.vlgmr.msra.gmra.mrb[24].mxu1 %v892_v62  ;;  %2057 = vmatmul.mubr.bf16.vlgmr.msra.gmra.mrb[24].mxu0 %v892_v62 }
 0x312   :  { %1006 = vmatpush1.bf16.msra.mxu1 %v2567_v55  ;;  %2061 = vmatpush3.bf16.msra.mxu0 %v2577_v61 }
 0x313   :  { %1007 = vmatprep.subr.bf16.mxu1 %v2572_v58  ;;  %2062 = vmatprep.subr.bf16.mxu0 %v3207_v35 }
 0x314   :  { %1037 = vmatprep.mubr.bf16.mxu1 %v3208_v46  ;;  %2076 = vmatprep.mubr.msk.bf16.mxu0 %vm2396_vm1, %v3207_v35 }
 0x316   :  { %1008 = vmatpush1.bf16.msra.mxu1 %v2583_v3  ;;  %2063 = vmatpush3.bf16.msra.mxu0 %v2596_v8 }
 0x317   :  { %1009 = vmatprep.subr.bf16.mxu1 %v2590_v6  ;;  %2064 = vmatprep.subr.bf16.mxu0 %v3207_v35 }
 0x31a   :  { %1010 = vmatpush1.bf16.msra.mxu1 %v2603_v11  ;;  %2065 = vmatpush3.bf16.msra.mxu0 %v2615_v14 }
 0x31b   :  { %1011 = vmatprep.subr.bf16.mxu1 %v2609_v13  ;;  %2066 = vmatprep.subr.bf16.mxu0 %v3207_v35 }
 0x31e   :  { %1012 = vmatpush1.bf16.msra.mxu1 %v2621_v15  ;;  %2067 = vmatpush3.bf16.msra.mxu0 %v2637_v17 }
 0x31f   :  { %1013 = vmatprep.subr.bf16.mxu1 %v2628_v16  ;;  %2068 = vmatprep.subr.bf16.mxu0 %v3207_v35 }
 0x322   :  { %1014 = vmatpush1.bf16.msra.mxu1 %v2643_v18  ;;  %2069 = vmatpush3.bf16.msra.mxu0 %v2656_v20 }
 0x323   :  { %1015 = vmatprep.subr.bf16.mxu1 %v2650_v19  ;;  %2070 = vmatprep.subr.bf16.mxu0 %v3207_v35 }
 0x326   :  { %1016 = vmatpush1.bf16.msra.mxu1 %v2662_v21  ;;  %2071 = vmatpush3.bf16.msra.mxu0 %v2676_v23 }
 0x327   :  { %1017 = vmatprep.subr.bf16.mxu1 %v2669_v22  ;;  %2072 = vmatprep.subr.bf16.mxu0 %v3207_v35 }
 0x32a   :  { %1018 = vmatpush1.bf16.msra.mxu1 %v2682_v24  ;;  %2073 = vmatpush3.bf16.msra.mxu0 %v2695_v26 }
 0x32b   :  { %1019 = vmatprep.subr.bf16.mxu1 %v2689_v25  ;;  %2074 = vmatprep.subr.bf16.mxu0 %v3207_v35 }
 0x32e   :  { %1020 = vmatpush1.bf16.msra.mxu1 %v2701_v27  ;;  %2075 = vmatpush3.bf16.msra.mxu0 %v2710_v28 }
 0x32f   :  { %1117 = vmatprep.subr.bf16.mxu1 %v2556_v38  ;;  %2080 = vmatprep.subr.bf16.mxu0 %v3207_v35 }
 0x3e4   :  { %v927_v53 = vpop.f32.mrb[24].mxu1  ;;  %v968_v33 = vpop.f32.mrb[24].mxu0 }
 0x3e5   :  { %v974_v37 = vadd.f32 %v927_v53, %v2774_v56  ;;  %v929_v41 = vpop.f32.mrb[25].mxu1  ;;  %v2058_v40 = vpop.f32.mrb[25].mxu0  ;;  %v988_v31 = vadd.f32 %v2813_v36, %v968_v33 }
 0x3e6   :  { %v981_v39 = vadd.f32 %v929_v41, %v2776_v60  ;;  %v931_v43 = vpop.f32.mrb[26].mxu1  ;;  %v971_v63 = vpop.f32.mrb[26].mxu0 }
 0x3e7   :  { %v1833_v9 = vmul.f32 -1.442695, %v974_v37  ;;  %v932_v54 = vpop.f32.mrb[27].mxu1  ;;  %v2059_v59 = vpop.f32.mrb[27].mxu0 }
 0x3e8   :  { %v1834_v2 = vmul.f32 -1.442695, %v981_v39 }
 0x3e9   :  { %2281 = vpow2.f32 %v1833_v9 }
 0x3ea   :  { %2283 = vpow2.f32 %v1834_v2 }
 0x3f3   :  { %v2282_v47 = vpop.eup %2281 }
 0x3f4   :  { %v978_v5 = vadd.f32 1.0, %v2282_v47  ;;  %v2284_v50 = vpop.eup %2283 }
 0x3f5   :  { %v985_v29 = vadd.f32 1.0, %v2284_v50 }
 0x3f6   :  { %2285 = vrcp.f32 %v978_v5 }
 0x3f7   :  { %2287 = vrcp.f32 %v985_v29 }
 0x400   :  { %v2286_v56 = vpop.eup %2285 }
 0x401   :  { %v989_v42 = vmul.f32 %v2286_v56, %v988_v31  ;;  %v2288_v48 = vpop.eup %2287 }
 0x402   :  { %v992_v52 = vsub.f32 1.0, %v2288_v48  ;;  %v994_v37 = vmul.f32 %v2288_v48, %v2862_v57 }
 0x403   :  { %v990_v60 = vadd.f32 %v989_v42, %v2760_v44 }
 0x405   :  { %2289 = vtanh.f32 %v990_v60 }
 0x40f   :  { %v2290_v62 = vpop.eup %2289 }
 0x410   :  { %v993_v53 = vmul.f32 %v2290_v62, %v992_v52 }
 0x412   :  { %v2906_v41 = vadd.f32 %v994_v37, %v993_v53 }
 0x414   :  { %v1004_v40 = vpack.c.bf16 %v2906_v41, %v2906_v41 }
 0x416   :  { %1038 = vmatmul.mubr.bf16.vlgmr.msra.gmra.mrb[28].mxu1 %v1004_v40  ;;  %2077 = vmatmul.mubr.bf16.vlgmr.msra.gmra.mrb[28].mxu0 %v1004_v40 }
 0x417   :  { %1118 = vmatpush1.bf16.msra.mxu1 %v2567_v55  ;;  %2081 = vmatpush3.bf16.msra.mxu0 %v2577_v61 }
 0x418   :  { %1119 = vmatprep.subr.bf16.mxu1 %v2572_v58  ;;  %2082 = vmatprep.subr.bf16.mxu0 %v3207_v35 }
 0x419   :  { %1149 = vmatprep.mubr.bf16.mxu1 %v3208_v46  ;;  %2096 = vmatprep.mubr.msk.bf16.mxu0 %vm2396_vm1, %v3207_v35 }
 0x41b   :  { %1120 = vmatpush1.bf16.msra.mxu1 %v2583_v3  ;;  %2083 = vmatpush3.bf16.msra.mxu0 %v2596_v8 }
 0x41c   :  { %1121 = vmatprep.subr.bf16.mxu1 %v2590_v6  ;;  %2084 = vmatprep.subr.bf16.mxu0 %v3207_v35 }
 0x41f   :  { %1122 = vmatpush1.bf16.msra.mxu1 %v2603_v11  ;;  %2085 = vmatpush3.bf16.msra.mxu0 %v2615_v14 }
 0x420   :  { %1123 = vmatprep.subr.bf16.mxu1 %v2609_v13  ;;  %2086 = vmatprep.subr.bf16.mxu0 %v3207_v35 }
 0x423   :  { %1124 = vmatpush1.bf16.msra.mxu1 %v2621_v15  ;;  %2087 = vmatpush3.bf16.msra.mxu0 %v2637_v17 }
 0x424   :  { %1125 = vmatprep.subr.bf16.mxu1 %v2628_v16  ;;  %2088 = vmatprep.subr.bf16.mxu0 %v3207_v35 }
 0x427   :  { %1126 = vmatpush1.bf16.msra.mxu1 %v2643_v18  ;;  %2089 = vmatpush3.bf16.msra.mxu0 %v2656_v20 }
 0x428   :  { %1127 = vmatprep.subr.bf16.mxu1 %v2650_v19  ;;  %2090 = vmatprep.subr.bf16.mxu0 %v3207_v35 }
 0x42b   :  { %1128 = vmatpush1.bf16.msra.mxu1 %v2662_v21  ;;  %2091 = vmatpush3.bf16.msra.mxu0 %v2676_v23 }
 0x42c   :  { %1129 = vmatprep.subr.bf16.mxu1 %v2669_v22  ;;  %2092 = vmatprep.subr.bf16.mxu0 %v3207_v35 }
 0x42f   :  { %1130 = vmatpush1.bf16.msra.mxu1 %v2682_v24  ;;  %2093 = vmatpush3.bf16.msra.mxu0 %v2695_v26 }
 0x430   :  { %1131 = vmatprep.subr.bf16.mxu1 %v2689_v25  ;;  %2094 = vmatprep.subr.bf16.mxu0 %v3207_v35 }
 0x433   :  { %1132 = vmatpush1.bf16.msra.mxu1 %v2701_v27  ;;  %2095 = vmatpush3.bf16.msra.mxu0 %v2710_v28 }
 0x434   :  { %1229 = vmatprep.subr.bf16.mxu1 %v2556_v38  ;;  %2100 = vmatprep.subr.bf16.mxu0 %v3207_v35 }
 0x4e9   :  { %v1039_v44 = vpop.f32.mrb[28].mxu1  ;;  %v1080_v33 = vpop.f32.mrb[28].mxu0 }
 0x4ea   :  { %v1086_v39 = vadd.f32 %v1039_v44, %v2781_v1  ;;  %v1041_v43 = vpop.f32.mrb[29].mxu1  ;;  %v2078_v63 = vpop.f32.mrb[29].mxu0  ;;  %v1100_v60 = vadd.f32 %v2813_v36, %v1080_v33 }
 0x4eb   :  { %v1093_v9 = vadd.f32 %v1041_v43, %v2786_v7  ;;  %v1043_v54 = vpop.f32.mrb[30].mxu1  ;;  %v1083_v59 = vpop.f32.mrb[30].mxu0 }
 0x4ec   :  { %v1835_v2 = vmul.f32 -1.442695, %v1086_v39  ;;  %v1044_v47 = vpop.f32.mrb[31].mxu1  ;;  %v2079_v5 = vpop.f32.mrb[31].mxu0 }
 0x4ed   :  { %v1836_v50 = vmul.f32 -1.442695, %v1093_v9 }
 0x4ee   :  { %2291 = vpow2.f32 %v1835_v2 }
 0x4ef   :  { %2293 = vpow2.f32 %v1836_v50 }
 0x4f8   :  { %v2292_v29 = vpop.eup %2291 }
 0x4f9   :  { %v1090_v31 = vadd.f32 1.0, %v2292_v29  ;;  %v2294_v56 = vpop.eup %2293 }
 0x4fa   :  { %v1097_v42 = vadd.f32 1.0, %v2294_v56 }
 0x4fb   :  { %2295 = vrcp.f32 %v1090_v31 }
 0x4fc   :  { %2297 = vrcp.f32 %v1097_v42 }
 0x505   :  { %v2296_v1 = vpop.eup %2295 }
 0x506   :  { %v1101_v48 = vmul.f32 %v2296_v1, %v1100_v60  ;;  %v2298_v52 = vpop.eup %2297 }
 0x507   :  { %v1104_v62 = vsub.f32 1.0, %v2298_v52  ;;  %v1106_v40 = vmul.f32 %v2298_v52, %v2906_v41 }
 0x508   :  { %v1102_v7 = vadd.f32 %v1101_v48, %v2769_v51 }
 0x50a   :  { %2299 = vtanh.f32 %v1102_v7 }
 0x514   :  { %v2300_v53 = vpop.eup %2299 }
 0x515   :  { %v1105_v37 = vmul.f32 %v2300_v53, %v1104_v62 }
 0x517   :  { %v2950_v44 = vadd.f32 %v1106_v40, %v1105_v37 }
 0x519   :  { %v1116_v39 = vpack.c.bf16 %v2950_v44, %v2950_v44 }
 0x51b   :  { %1150 = vmatmul.mubr.bf16.vlgmr.msra.gmra.mrb[32].mxu1 %v1116_v39  ;;  %2097 = vmatmul.mubr.bf16.vlgmr.msra.gmra.mrb[32].mxu0 %v1116_v39 }
 0x51c   :  { %1230 = vmatpush1.bf16.msra.mxu1 %v2567_v55  ;;  %2101 = vmatpush3.bf16.msra.mxu0 %v2577_v61 }
 0x51d   :  { %1231 = vmatprep.subr.bf16.mxu1 %v2572_v58  ;;  %2102 = vmatprep.subr.bf16.mxu0 %v3207_v35 }
 0x51e   :  { %1261 = vmatprep.mubr.bf16.mxu1 %v3208_v46  ;;  %2116 = vmatprep.mubr.msk.bf16.mxu0 %vm2396_vm1, %v3207_v35 }
 0x520   :  { %1232 = vmatpush1.bf16.msra.mxu1 %v2583_v3  ;;  %2103 = vmatpush3.bf16.msra.mxu0 %v2596_v8 }
 0x521   :  { %1233 = vmatprep.subr.bf16.mxu1 %v2590_v6  ;;  %2104 = vmatprep.subr.bf16.mxu0 %v3207_v35 }
 0x524   :  { %1234 = vmatpush1.bf16.msra.mxu1 %v2603_v11  ;;  %2105 = vmatpush3.bf16.msra.mxu0 %v2615_v14 }
 0x525   :  { %1235 = vmatprep.subr.bf16.mxu1 %v2609_v13  ;;  %2106 = vmatprep.subr.bf16.mxu0 %v3207_v35 }
 0x528   :  { %1236 = vmatpush1.bf16.msra.mxu1 %v2621_v15  ;;  %2107 = vmatpush3.bf16.msra.mxu0 %v2637_v17 }
 0x529   :  { %1237 = vmatprep.subr.bf16.mxu1 %v2628_v16  ;;  %2108 = vmatprep.subr.bf16.mxu0 %v3207_v35 }
 0x52c   :  { %1238 = vmatpush1.bf16.msra.mxu1 %v2643_v18  ;;  %2109 = vmatpush3.bf16.msra.mxu0 %v2656_v20 }
 0x52d   :  { %1239 = vmatprep.subr.bf16.mxu1 %v2650_v19  ;;  %2110 = vmatprep.subr.bf16.mxu0 %v3207_v35 }
 0x530   :  { %1240 = vmatpush1.bf16.msra.mxu1 %v2662_v21  ;;  %2111 = vmatpush3.bf16.msra.mxu0 %v2676_v23 }
 0x531   :  { %1241 = vmatprep.subr.bf16.mxu1 %v2669_v22  ;;  %2112 = vmatprep.subr.bf16.mxu0 %v3207_v35 }
 0x534   :  { %1242 = vmatpush1.bf16.msra.mxu1 %v2682_v24  ;;  %2113 = vmatpush3.bf16.msra.mxu0 %v2695_v26 }
 0x535   :  { %1243 = vmatprep.subr.bf16.mxu1 %v2689_v25  ;;  %2114 = vmatprep.subr.bf16.mxu0 %v3207_v35 }
 0x538   :  { %1244 = vmatpush1.bf16.msra.mxu1 %v2701_v27  ;;  %2115 = vmatpush3.bf16.msra.mxu0 %v2710_v28 }
 0x539   :  { %1341 = vmatprep.subr.bf16.mxu1 %v2556_v38  ;;  %2120 = vmatprep.subr.bf16.mxu0 %v3207_v35 }
 0x5ee   :  { %v1151_v51 = vpop.f32.mrb[32].mxu1  ;;  %v1192_v33 = vpop.f32.mrb[32].mxu0 }
 0x5ef   :  { %v1198_v43 = vadd.f32 %v1151_v51, %v2794_v30  ;;  %v1153_v63 = vpop.f32.mrb[33].mxu1  ;;  %v2098_v9 = vpop.f32.mrb[33].mxu0  ;;  %v1212_v60 = vadd.f32 %v2813_v36, %v1192_v33 }
 0x5f0   :  { %v1205_v54 = vadd.f32 %v1153_v63, %v2796_v32  ;;  %v1155_v59 = vpop.f32.mrb[34].mxu1  ;;  %v1195_v2 = vpop.f32.mrb[34].mxu0  ;;  %v2374_v9 = vld [vmem:[%s3192_s5] ss:$12 sps:$4 sm:$0xff]  }
 0x5f1   :  { %v1837_v47 = vmul.f32 -1.442695, %v1198_v43  ;;  %v1156_v5 = vpop.f32.mrb[35].mxu1  ;;  %v2099_v50 = vpop.f32.mrb[35].mxu0  ;;  %v2377_v59 = vld [vmem:[%s3192_s5 + $0x18] ss:$12 sps:$4 sm:$0xff]  }
 0x5f2   :  { %v1838_v29 = vmul.f32 -1.442695, %v1205_v54  ;;  %v2376_v54 = vld [vmem:[%s3192_s5 + $0x1c] ss:$12 sps:$4 sm:$0xff]   ;;  %v2378_v2 = vld [vmem:[%s3192_s5 + $0x20] ss:$12 sps:$4 sm:$0xff]  }
 0x5f3   :  { %2301 = vpow2.f32 %v1837_v47  ;;  %v2379_v47 = vld [vmem:[%s3192_s5 + $0x34] ss:$12 sps:$4 sm:$0xff]   ;;  %v2381_v5 = vld [vmem:[%s3192_s5 + $0x38] ss:$12 sps:$4 sm:$0xff]  }
 0x5f4   :  { %2303 = vpow2.f32 %v1838_v29  ;;  %v2382_v50 = vld [vmem:[%s3192_s5 + $0x4c] ss:$12 sps:$4 sm:$0xff]   ;;  %v2383_v29 = vld [vmem:[%s3192_s5 + $0x48] ss:$12 sps:$4 sm:$0xff]  }
 0x5fd   :  { %v2302_v31 = vpop.eup %2301 }
 0x5fe   :  { %v1202_v38 = vadd.f32 1.0, %v2302_v31  ;;  %v2304_v56 = vpop.eup %2303  ;;  %v2384_v31 = vld [vmem:[%s3192_s5 + $0x50] ss:$12 sps:$4 sm:$0xff]  }
 0x5ff   :  { %v1209_v42 = vadd.f32 1.0, %v2304_v56  ;;  %v2386_v56 = vld [vmem:[%s3192_s5 + $0x60] ss:$12 sps:$4 sm:$0xff]  }
 0x600   :  { %2305 = vrcp.f32 %v1202_v38  ;;  %v2385_v38 = vld [vmem:[%s3192_s5 + $0x64] ss:$12 sps:$4 sm:$0xff]  }
 0x601   :  { %2307 = vrcp.f32 %v1209_v42  ;;  %v2387_v42 = vld [vmem:[%s3192_s5 + $0x68] ss:$12 sps:$4 sm:$0xff]  }
 0x60a   :  { %v2306_v30 = vpop.eup %2305 }
 0x60b   :  { %v1213_v1 = vmul.f32 %v2306_v30, %v1212_v60  ;;  %v2308_v48 = vpop.eup %2307  ;;  %v2388_v60 = vld [vmem:[%s3192_s5 + $0x7c] ss:$12 sps:$4 sm:$0xff]   ;;  %v2389_v30 = vld [vmem:[%s3192_s5 + $0x78] ss:$12 sps:$4 sm:$0xff]  }
 0x60c   :  { %v1216_v7 = vsub.f32 1.0, %v2308_v48  ;;  %v1218_v53 = vmul.f32 %v2308_v48, %v2950_v44  ;;  %v2392_v48 = vld [vmem:[%s3192_s5 + $0x90] ss:$12 sps:$4 sm:$0xff]  }
 0x60d   :  { %v1214_v32 = vadd.f32 %v1213_v1, %v2784_v4  ;;  %v2390_v1 = vld [vmem:[%s3192_s5 + $0x80] ss:$12 sps:$4 sm:$0xff]  }
 0x60f   :  { %2309 = vtanh.f32 %v1214_v32  ;;  %v2391_v32 = vld [vmem:[%s3192_s5 + $0x94] ss:$12 sps:$4 sm:$0xff]  }
 0x619   :  { %v2310_v52 = vpop.eup %2309 }
 0x61a   :  { %v1217_v62 = vmul.f32 %v2310_v52, %v1216_v7  ;;  %v2393_v7 = vld [vmem:[%s3192_s5 + $0xac] ss:$12 sps:$4 sm:$0xff]   ;;  %v2253_v52 = vld [vmem:[%s3196_s7] sm:$0xff]  }
 0x61c   :  { %v2994_v37 = vadd.f32 %v1218_v53, %v1217_v62 }
 0x61e   :  { %v1228_v40 = vpack.c.bf16 %v2994_v37, %v2994_v37 }
 0x620   :  { %1262 = vmatmul.mubr.bf16.vlgmr.msra.gmra.mrb[36].mxu1 %v1228_v40  ;;  %2117 = vmatmul.mubr.bf16.vlgmr.msra.gmra.mrb[36].mxu0 %v1228_v40 }
 0x621   :  { %1342 = vmatpush1.bf16.msra.mxu1 %v2567_v55  ;;  %2121 = vmatpush3.bf16.msra.mxu0 %v2577_v61  ;;  %v2373_v55 = vld [vmem:[%s3192_s5 + $0x4] ss:$12 sps:$4 sm:$0xff]  }
 0x622   :  { %1343 = vmatprep.subr.bf16.mxu1 %v2572_v58  ;;  %2122 = vmatprep.subr.bf16.mxu0 %v3207_v35 }
 0x623   :  { %1373 = vmatprep.mubr.bf16.mxu1 %v3208_v46  ;;  %2136 = vmatprep.mubr.msk.bf16.mxu0 %vm2396_vm1, %v3207_v35 }
 0x625   :  { %1344 = vmatpush1.bf16.msra.mxu1 %v2583_v3  ;;  %2123 = vmatpush3.bf16.msra.mxu0 %v2596_v8 }
 0x626   :  { %1345 = vmatprep.subr.bf16.mxu1 %v2590_v6  ;;  %2124 = vmatprep.subr.bf16.mxu0 %v3207_v35 }
 0x629   :  { %1346 = vmatpush1.bf16.msra.mxu1 %v2603_v11  ;;  %2125 = vmatpush3.bf16.msra.mxu0 %v2615_v14 }
 0x62a   :  { %1347 = vmatprep.subr.bf16.mxu1 %v2609_v13  ;;  %2126 = vmatprep.subr.bf16.mxu0 %v3207_v35 }
 0x62d   :  { %1348 = vmatpush1.bf16.msra.mxu1 %v2621_v15  ;;  %2127 = vmatpush3.bf16.msra.mxu0 %v2637_v17 }
 0x62e   :  { %1349 = vmatprep.subr.bf16.mxu1 %v2628_v16  ;;  %2128 = vmatprep.subr.bf16.mxu0 %v3207_v35 }
 0x631   :  { %1350 = vmatpush1.bf16.msra.mxu1 %v2643_v18  ;;  %2129 = vmatpush3.bf16.msra.mxu0 %v2656_v20 }
 0x632   :  { %1351 = vmatprep.subr.bf16.mxu1 %v2650_v19  ;;  %2130 = vmatprep.subr.bf16.mxu0 %v3207_v35 }
 0x635   :  { %1352 = vmatpush1.bf16.msra.mxu1 %v2662_v21  ;;  %2131 = vmatpush3.bf16.msra.mxu0 %v2676_v23 }
 0x636   :  { %1353 = vmatprep.subr.bf16.mxu1 %v2669_v22  ;;  %2132 = vmatprep.subr.bf16.mxu0 %v3207_v35 }
 0x639   :  { %1354 = vmatpush1.bf16.msra.mxu1 %v2682_v24  ;;  %2133 = vmatpush3.bf16.msra.mxu0 %v2695_v26 }
 0x63a   :  { %1355 = vmatprep.subr.bf16.mxu1 %v2689_v25  ;;  %2134 = vmatprep.subr.bf16.mxu0 %v3207_v35 }
 0x63d   :  { %1356 = vmatpush1.bf16.msra.mxu1 %v2701_v27  ;;  %2135 = vmatpush3.bf16.msra.mxu0 %v2710_v28 }
 0x63e   :  { %1453 = vmatprep.subr.bf16.mxu1 %v2373_v55  ;;  %2140 = vmatprep.subr.bf16.mxu0 %v3207_v35 }
 0x6f3   :  { %v1263_v58 = vpop.f32.mrb[36].mxu1  ;;  %v1304_v61 = vpop.f32.mrb[36].mxu0 }
 0x6f4   :  { %v1310_v3 = vadd.f32 %v1263_v58, %v2798_v34  ;;  %v1265_v6 = vpop.f32.mrb[37].mxu1  ;;  %v2118_v8 = vpop.f32.mrb[37].mxu0  ;;  %v1324_v23 = vadd.f32 %v2813_v36, %v1304_v61  ;;  %v3209_v58 = vld [vmem:[#allocation6_spill] sm:$0xff] }
 0x6f5   :  { %v1317_v11 = vadd.f32 %v1265_v6, %v2800_v45  ;;  %v1267_v13 = vpop.f32.mrb[38].mxu1  ;;  %v1307_v14 = vpop.f32.mrb[38].mxu0 }
 0x6f6   :  { %v1839_v15 = vmul.f32 -1.442695, %v1310_v3  ;;  %v1268_v16 = vpop.f32.mrb[39].mxu1  ;;  %v2119_v17 = vpop.f32.mrb[39].mxu0 }
 0x6f7   :  { %v1840_v18 = vmul.f32 -1.442695, %v1317_v11 }
 0x6f8   :  { %2311 = vpow2.f32 %v1839_v15 }
 0x6f9   :  { %2313 = vpow2.f32 %v1840_v18  ;;  %v3210_v18 = vld [vmem:[#allocation4_spill] sm:$0xff] }
 0x702   :  { %v2312_v19 = vpop.eup %2311 }
 0x703   :  { %v1314_v20 = vadd.f32 1.0, %v2312_v19  ;;  %v2314_v21 = vpop.eup %2313 }
 0x704   :  { %v1321_v22 = vadd.f32 1.0, %v2314_v21 }
 0x705   :  { %2315 = vrcp.f32 %v1314_v20 }
 0x706   :  { %2317 = vrcp.f32 %v1321_v22 }
 0x70f   :  { %v2316_v24 = vpop.eup %2315 }
 0x710   :  { %v1325_v25 = vmul.f32 %v2316_v24, %v1324_v23  ;;  %v2318_v34 = vpop.eup %2317 }
 0x711   :  { %v1328_v45 = vsub.f32 1.0, %v2318_v34  ;;  %v1330_v33 = vmul.f32 %v2318_v34, %v2994_v37  ;;  %v2254_v34 = vld [vmem:[%s3196_s7 + $0x8] sm:$0xff]  }
 0x712   :  { %v1326_v4 = vadd.f32 %v1325_v25, %v2792_v12  ;;  %v2375_v12 = vld [vmem:[%s3192_s5 + $0x8] ss:$12 sps:$4 sm:$0xff]  }
 0x714   :  { %2319 = vtanh.f32 %v1326_v4 }
 0x71e   :  { %v2320_v39 = vpop.eup %2319 }
 0x71f   :  { %v1329_v51 = vmul.f32 %v2320_v39, %v1328_v45  ;;  %v1566_v45 = vpack.c.bf16 %v2862_v57, %v2818_v10  ;;  %v2255_v39 = vld [vmem:[%s3196_s7 + $0x10] sm:$0xff]   ;;  %v2257_v10 = vld [vmem:[%s3196_s7 + $0x20] sm:$0xff]   ;;  %v2258_v57 = vld [vmem:[%s3196_s7 + $0x28] sm:$0xff]  }
 0x721   :  { %v3040_v43 = vadd.f32 %v1330_v33, %v1329_v51  ;;  %v2256_v51 = vld [vmem:[%s3196_s7 + $0x18] sm:$0xff]   ;;  %v2259_v33 = vld [vmem:[%s3196_s7 + $0x30] sm:$0xff]  }
 0x723   :  { %v1340_v63 = vpack.c.bf16 %v3040_v43, %v3040_v43 }
 0x725   :  { %1374 = vmatmul.mubr.bf16.vlgmr.msra.gmra.mrb[40].mxu1 %v1340_v63  ;;  %2137 = vmatmul.mubr.bf16.vlgmr.msra.gmra.mrb[40].mxu0 %v1340_v63  ;;  %v2260_v63 = vld [vmem:[%s3196_s7 + $0x38] sm:$0xff]  }
 0x726   :  { %1454 = vmatpush1.bf16.msra.mxu1 %v2374_v9  ;;  %2141 = vmatpush3.bf16.msra.mxu0 %v2375_v12  ;;  %v1567_v9 = vpack.c.bf16 %v2950_v44, %v2906_v41  ;;  %v1568_v12 = vpack.c.bf16 %v3040_v43, %v2994_v37 }
 0x727   :  { %1455 = vmatprep.subr.bf16.mxu1 %v2376_v54  ;;  %2142 = vmatprep.subr.bf16.mxu0 %v3207_v35 }
 0x728   :  { %1485 = vmatprep.mubr.bf16.mxu1 %v3208_v46  ;;  %2156 = vmatprep.mubr.msk.bf16.mxu0 %vm2396_vm1, %v3207_v35  ;;  %v2380_v46 = vld [vmem:[%s3192_s5 + $0x30] ss:$12 sps:$4 sm:$0xff]  }
 0x72a   :  { %1456 = vmatpush1.bf16.msra.mxu1 %v2377_v59  ;;  %2143 = vmatpush3.bf16.msra.mxu0 %v2378_v2  ;;  %v3211_v2 = vld [vmem:[#allocation7_spill] sm:$0xff] }
 0x72b   :  { %1457 = vmatprep.subr.bf16.mxu1 %v2379_v47  ;;  %2144 = vmatprep.subr.bf16.mxu0 %v3207_v35 }
 0x72e   :  { %1458 = vmatpush1.bf16.msra.mxu1 %v2380_v46  ;;  %2145 = vmatpush3.bf16.msra.mxu0 %v2381_v5 }
 0x72f   :  { %1459 = vmatprep.subr.bf16.mxu1 %v2382_v50  ;;  %2146 = vmatprep.subr.bf16.mxu0 %v3207_v35 }
 0x732   :  { %1460 = vmatpush1.bf16.msra.mxu1 %v2383_v29  ;;  %2147 = vmatpush3.bf16.msra.mxu0 %v2384_v31 }
 0x733   :  { %1461 = vmatprep.subr.bf16.mxu1 %v2385_v38  ;;  %2148 = vmatprep.subr.bf16.mxu0 %v3207_v35 }
 0x736   :  { %1462 = vmatpush1.bf16.msra.mxu1 %v2386_v56  ;;  %2149 = vmatpush3.bf16.msra.mxu0 %v2387_v42 }
 0x737   :  { %1463 = vmatprep.subr.bf16.mxu1 %v2388_v60  ;;  %2150 = vmatprep.subr.bf16.mxu0 %v3207_v35 }
 0x73a   :  { %1464 = vmatpush1.bf16.msra.mxu1 %v2389_v30  ;;  %2151 = vmatpush3.bf16.msra.mxu0 %v2390_v1 }
 0x73b   :  { %1465 = vmatprep.subr.bf16.mxu1 %v2391_v32  ;;  %2152 = vmatprep.subr.bf16.mxu0 %v3207_v35 }
 0x73e   :  { %1466 = vmatpush1.bf16.msra.mxu1 %v2392_v48  ;;  %2153 = vmatpush3.bf16.msra.mxu0 %v2695_v26  ;;  %v3212_v48 = vld [vmem:[#allocation5_spill] sm:$0xff] }
 0x73f   :  { %1467 = vmatprep.subr.bf16.mxu1 %v2393_v7  ;;  %2154 = vmatprep.subr.bf16.mxu0 %v3207_v35 }
 0x742   :  { %1468 = vmatpush1.bf16.msra.mxu1 %v2701_v27  ;;  %2155 = vmatpush3.bf16.msra.mxu0 %v2710_v28 }
 0x743   :  { %2160 = vmatprep.subr.bf16.mxu1 %v2253_v52 }
 0x7f8   :  { %v1375_v62 = vpop.f32.mrb[40].mxu1  ;;  %v1416_v53 = vpop.f32.mrb[40].mxu0 }
 0x7f9   :  { %v1422_v26 = vadd.f32 %v1375_v62, %v2802_v49  ;;  %v1377_v40 = vpop.f32.mrb[41].mxu1  ;;  %v2138_v55 = vpop.f32.mrb[41].mxu0  ;;  %v1436_v16 = vadd.f32 %v2813_v36, %v1416_v53 }
 0x7fa   :  { %v1429_v61 = vadd.f32 %v1377_v40, %v3209_v58  ;;  %v1379_v3 = vpop.f32.mrb[42].mxu1  ;;  %v1419_v6 = vpop.f32.mrb[42].mxu0 }
 0x7fb   :  { %v1841_v35 = vmul.f32 -1.442695, %v1422_v26  ;;  %v1380_v8 = vpop.f32.mrb[43].mxu1  ;;  %v2139_v27 = vpop.f32.mrb[43].mxu0 }
 0x7fc   :  { %v1842_v28 = vmul.f32 -1.442695, %v1429_v61 }
 0x7fd   :  { %2321 = vpow2.f32 %v1841_v35 }
 0x7fe   :  { %2323 = vpow2.f32 %v1842_v28 }
 0x807   :  { %v2322_v11 = vpop.eup %2321 }
 0x808   :  { %v1426_v13 = vadd.f32 1.0, %v2322_v11  ;;  %v2324_v14 = vpop.eup %2323 }
 0x809   :  { %v1433_v15 = vadd.f32 1.0, %v2324_v14 }
 0x80a   :  { %2325 = vrcp.f32 %v1426_v13 }
 0x80b   :  { %2327 = vrcp.f32 %v1433_v15 }
 0x814   :  { %v2326_v49 = vpop.eup %2325 }
 0x815   :  { %v1437_v17 = vmul.f32 %v2326_v49, %v1436_v16  ;;  %v2328_v20 = vpop.eup %2327 }
 0x816   :  { %v1440_v21 = vsub.f32 1.0, %v2328_v20  ;;  %v1442_v24 = vmul.f32 %v2328_v20, %v3040_v43 }
 0x817   :  { %v1438_v19 = vadd.f32 %v1437_v17, %v3210_v18 }
 0x819   :  { %2329 = vtanh.f32 %v1438_v19 }
 0x823   :  { %v2330_v22 = vpop.eup %2329 }
 0x824   :  { %v1441_v23 = vmul.f32 %v2330_v22, %v1440_v21 }
 0x826   :  { %v3125_v25 = vadd.f32 %v1442_v24, %v1441_v23 }
 0x828   :  { %v1452_v4 = vpack.c.bf16 %v3125_v25, %v3125_v25 }
 0x82a   :  { %1486 = vmatmul.mubr.bf16.vlgmr.msra.gmra.mrb[44].mxu1 %v1452_v4  ;;  %2157 = vmatmul.mubr.bf16.vlgmr.msra.gmra.mrb[44].mxu0 %v1452_v4 }
 0x82b   :  { %2161 = vmatpush3.bf16.msra.mxu1 %v2253_v52  ;;  %2176 = vmatprep.mubr.bf16.mxu1 %v1566_v45 }
 0x82c   :  { %2162 = vmatprep.subr.bf16.mxu1 %v2254_v34 }
 0x82f   :  { %2163 = vmatpush3.bf16.msra.mxu1 %v2254_v34 }
 0x830   :  { %2164 = vmatprep.subr.bf16.mxu1 %v2255_v39 }
 0x833   :  { %2165 = vmatpush3.bf16.msra.mxu1 %v2255_v39 }
 0x834   :  { %2166 = vmatprep.subr.bf16.mxu1 %v2256_v51 }
 0x837   :  { %2167 = vmatpush3.bf16.msra.mxu1 %v2256_v51 }
 0x838   :  { %2168 = vmatprep.subr.bf16.mxu1 %v2257_v10 }
 0x83b   :  { %2169 = vmatpush3.bf16.msra.mxu1 %v2257_v10 }
 0x83c   :  { %2170 = vmatprep.subr.bf16.mxu1 %v2258_v57 }
 0x83f   :  { %2171 = vmatpush3.bf16.msra.mxu1 %v2258_v57 }
 0x840   :  { %2172 = vmatprep.subr.bf16.mxu1 %v2259_v33 }
 0x843   :  { %2173 = vmatpush3.bf16.msra.mxu1 %v2259_v33 }
 0x844   :  { %2174 = vmatprep.subr.bf16.mxu1 %v2260_v63 }
 0x847   :  { %2175 = vmatpush3.bf16.msra.mxu1 %v2260_v63 }
 0x84a   :  { %2177 = vmatmul.mubr.bf16.vlgmr.msra.gmra.mrb[48].mxu1 %v1567_v9 }
 0x84b   :  { %2180 = vmatprep.mubr.bf16.mxu1 %v1568_v12 }
 0x8fd   :  { %v1487_v54 = vpop.f32.mrb[44].mxu1  ;;  %v1528_v59 = vpop.f32.mrb[44].mxu0 }
 0x8fe   :  { %v1534_v47 = vadd.f32 %v1487_v54, %v3211_v2  ;;  %v1489_v46 = vpop.f32.mrb[45].mxu1  ;;  %v2158_v5 = vpop.f32.mrb[45].mxu0  ;;  %v1548_v30 = vadd.f32 %v2813_v36, %v1528_v59 }
 0x8ff   :  { %v1541_v50 = vadd.f32 %v1489_v46, %v2808_v0  ;;  %v1491_v29 = vpop.f32.mrb[46].mxu1  ;;  %v1531_v31 = vpop.f32.mrb[46].mxu0  ;;  %v1845_v0 = vld [vmem:[%s3197_s8] ss:$0 sm:$0xff] }
 0x900   :  { %v1843_v38 = vmul.f32 -1.442695, %v1534_v47  ;;  %v1492_v56 = vpop.f32.mrb[47].mxu1  ;;  %v2159_v42 = vpop.f32.mrb[47].mxu0 }
 0x901   :  { %v1844_v41 = vmul.f32 -1.442695, %v1541_v50 }
 0x902   :  { %2331 = vpow2.f32 %v1843_v38 }
 0x903   :  { %2333 = vpow2.f32 %v1844_v41 }
 0x90c   :  { %v2332_v44 = vpop.eup %2331 }
 0x90d   :  { %v1538_v37 = vadd.f32 1.0, %v2332_v44  ;;  %v2334_v43 = vpop.eup %2333 }
 0x90e   :  { %v1545_v60 = vadd.f32 1.0, %v2334_v43 }
 0x90f   :  { %2335 = vrcp.f32 %v1538_v37 }
 0x910   :  { %2337 = vrcp.f32 %v1545_v60 }
 0x919   :  { %v2336_v1 = vpop.eup %2335 }
 0x91a   :  { %v1549_v32 = vmul.f32 %v2336_v1, %v1548_v30  ;;  %v2338_v8 = vpop.eup %2337 }
 0x91b   :  { %v1552_v27 = vsub.f32 1.0, %v2338_v8  ;;  %v1554_v13 = vmul.f32 %v2338_v8, %v3125_v25 }
 0x91c   :  { %v1550_v7 = vadd.f32 %v1549_v32, %v3212_v48 }
 0x91d   :  { %v2178_v52 = vpop.f32.mrb[48].mxu1 }
 0x91e   :  { %2339 = vtanh.f32 %v1550_v7  ;;  %v1684_v62 = vadd.f32 %v2178_v52, %v1845_v0  ;;  %v1675_v53 = vpop.f32.mrb[49].mxu1 }
 0x91f   :  { %v1676_v26 = vadd.f32 %v1845_v0, %v1675_v53  ;;  %v2179_v40 = vpop.f32.mrb[50].mxu1 }
 0x920   :  { %v1856_v55 = vmul.f32 -1.442695, %v1684_v62  ;;  %v1687_v58 = vadd.f32 %v2179_v40, %v1845_v0  ;;  %v1678_v61 = vpop.f32.mrb[51].mxu1 }
 0x921   :  { %v1854_v3 = vmul.f32 -1.442695, %v1676_v26  ;;  %v1679_v36 = vadd.f32 %v1845_v0, %v1678_v61 }
 0x922   :  { %2341 = vpow2.f32 %v1856_v55  ;;  %v1857_v6 = vmul.f32 -1.442695, %v1687_v58 }
 0x923   :  { %2343 = vpow2.f32 %v1854_v3  ;;  %v1855_v35 = vmul.f32 -1.442695, %v1679_v36 }
 0x924   :  { %2345 = vpow2.f32 %v1857_v6 }
 0x925   :  { %2347 = vpow2.f32 %v1855_v35 }
 0x928   :  { %v2340_v28 = vpop.eup %2339 }
 0x929   :  { %v1553_v11 = vmul.f32 %v2340_v28, %v1552_v27 }
 0x92b   :  { %v1555_v14 = vadd.f32 %v1554_v13, %v1553_v11 }
 0x92c   :  { %v2342_v15 = vpop.eup %2341 }
 0x92d   :  { %v2344_v16 = vpop.eup %2343  ;;  %v1732_v49 = vadd.f32 1.0, %v2342_v15  ;;  %v1569_v17 = vpack.c.bf16 %v1555_v14, %v3125_v25 }
 0x92e   :  { %v2346_v18 = vpop.eup %2345  ;;  %v1730_v19 = vadd.f32 1.0, %v2344_v16 }
 0x92f   :  { %v2348_v20 = vpop.eup %2347  ;;  %2349 = vrcp.f32 %v1732_v49  ;;  %v1733_v21 = vadd.f32 1.0, %v2346_v18  ;;  %2181 = vmatmul.mubr.bf16.gmra.mrb[52].mxu1 %v1569_v17 }
 0x930   :  { %2351 = vrcp.f32 %v1730_v19  ;;  %v1731_v22 = vadd.f32 1.0, %v2348_v20 }
 0x931   :  { %2353 = vrcp.f32 %v1733_v21 }
 0x932   :  { %2355 = vrcp.f32 %v1731_v22 }
 0x939   :  { %v2350_v23 = vpop.eup %2349 }
 0x93a   :  { %v2352_v24 = vpop.eup %2351  ;;  %1756 = vst [vmem:[%s3198_s9 + $0x10] sm:$0xff] %v2350_v23 }
 0x93b   :  { %v2354_v4 = vpop.eup %2353  ;;  %1754 = vst [vmem:[%s3198_s9] sm:$0xff] %v2352_v24 }
 0x93c   :  { %v2356_v25 = vpop.eup %2355  ;;  %1757 = vst [vmem:[%s3198_s9 + $0x18] sm:$0xff] %v2354_v4 }
 0x93d   :  { %1755 = vst [vmem:[%s3198_s9 + $0x8] sm:$0xff] %v2356_v25 }
 0xa02   :  { %v2182_v34 = vpop.f32.mrb[52].mxu1 }
 0xa03   :  { %v1700_v45 = vadd.f32 %v2182_v34, %v1845_v0  ;;  %v1691_v39 = vpop.f32.mrb[53].mxu1 }
 0xa04   :  { %v1692_v51 = vadd.f32 %v1845_v0, %v1691_v39  ;;  %v2183_v10 = vpop.f32.mrb[54].mxu1 }
 0xa05   :  { %v1860_v57 = vmul.f32 -1.442695, %v1700_v45  ;;  %v1703_v33 = vadd.f32 %v2183_v10, %v1845_v0  ;;  %v1694_v63 = vpop.f32.mrb[55].mxu1 }
 0xa06   :  { %v1858_v9 = vmul.f32 -1.442695, %v1692_v51  ;;  %v1695_v12 = vadd.f32 %v1845_v0, %v1694_v63 }
 0xa07   :  { %2357 = vpow2.f32 %v1860_v57  ;;  %v1861_v54 = vmul.f32 -1.442695, %v1703_v33 }
 0xa08   :  { %2359 = vpow2.f32 %v1858_v9  ;;  %v1859_v59 = vmul.f32 -1.442695, %v1695_v12 }
 0xa09   :  { %2361 = vpow2.f32 %v1861_v54 }
 0xa0a   :  { %2363 = vpow2.f32 %v1859_v59 }
 0xa11   :  { %v2358_v2 = vpop.eup %2357 }
 0xa12   :  { %v2360_v47 = vpop.eup %2359  ;;  %v1736_v46 = vadd.f32 1.0, %v2358_v2 }
 0xa13   :  { %v2362_v5 = vpop.eup %2361  ;;  %v1734_v50 = vadd.f32 1.0, %v2360_v47 }
 0xa14   :  { %v2364_v29 = vpop.eup %2363  ;;  %2365 = vrcp.f32 %v1736_v46  ;;  %v1737_v31 = vadd.f32 1.0, %v2362_v5 }
 0xa15   :  { %2367 = vrcp.f32 %v1734_v50  ;;  %v1735_v38 = vadd.f32 1.0, %v2364_v29 }
 0xa16   :  { %2369 = vrcp.f32 %v1737_v31 }
 0xa17   :  { %2371 = vrcp.f32 %v1735_v38 }
 0xa1e   :  { %v2366_v56 = vpop.eup %2365 }
 0xa1f   :  { %v2368_v42 = vpop.eup %2367  ;;  %1760 = vst [vmem:[%s3198_s9 + $0x30] sm:$0xff] %v2366_v56 }
 0xa20   :  { %v2370_v41 = vpop.eup %2369  ;;  %1758 = vst [vmem:[%s3198_s9 + $0x20] sm:$0xff] %v2368_v42 }
 0xa21   :  { %v2372_v44 = vpop.eup %2371  ;;  %1761 = vst [vmem:[%s3198_s9 + $0x38] sm:$0xff] %v2370_v41 }
 0xa22   :  { %1759 = vst [vmem:[%s3198_s9 + $0x28] sm:$0xff] %v2372_v44 }

</bundles_post_ra>
